<compile_context>
chip_gen: v7x
topology: tpu7x:2x2x1
jax: 0.10.0
libtpu: 0.0.40
codegen_flags: <defaults>
</compile_context>

<pallas_src>
import math

import jax
import jax.numpy as jnp
from jax.experimental import pallas as pl
from jax.experimental.pallas import tpu as pltpu


def lstm_kernel(aug_ref, wh_ref, waug_ref, wp_ref, bp_ref, out_ref):
    # aug_ref : (T, 8, BP)  per-step [x_t ; gate-bias rows ; zero pad], lane-padded
    # wh_ref  : (4H, H)     recurrent weights of [g, i, f, o] stacked (rows H: pre-scaled 0.5)
    # waug_ref: (4H, 8)     [wx | gate-selector | 0] (rows H: pre-scaled 0.5)
    # wp_ref  : (H, H), bp_ref: (H, BP)
    # out_ref : (H, BP)
    T = aug_ref.shape[0]
    H = wp_ref.shape[0]
    BP = aug_ref.shape[2]

    def step(t, carry):
        prev_h, prev_c = carry
        # Recurrent matmul (serial critical path) + fused input-projection/bias
        # matmul (independent of prev_h -> hidden under the MXU/EUP chain).
        pre = (jnp.dot(wh_ref[...], prev_h, preferred_element_type=jnp.float32)
               + jnp.dot(waug_ref[...], aug_ref[t],
                         preferred_element_type=jnp.float32))      # (4H, BP)
        # Rows [H, 4H) of wh/waug were pre-scaled by 0.5 at pack time, so one
        # contiguous tanh over the whole pre-activation covers all four gates:
        #   sigmoid(z) = 0.5 * tanh(0.5 * z) + 0.5
        th = jnp.tanh(pre)                                         # single EUP stream
        g = th[:H]
        s = 0.5 * th[H:] + 0.5                                     # i, f, o stacked (3H, BP)
        i = s[:H]
        f = s[H:2 * H]
        o = s[2 * H:]
        c = g * i + prev_c * f
        h = jnp.tanh(c) * o
        return h, c                                                # state stays in vregs

    h0 = jnp.zeros((H, BP), jnp.float32)
    c0 = jnp.zeros((H, BP), jnp.float32)
    h, _ = jax.lax.fori_loop(0, T, step, (h0, c0), unroll=True)

    # Output projection, lane-dense (H, BP) store.
    out_ref[...] = (jnp.dot(wp_ref[...], h, preferred_element_type=jnp.float32)
                    + bp_ref[...])


def pack_params(params, batch_size):
    """One-time packing of PyTorch-style parameters into the kernel layout."""
    w_g, b_g, w_i, b_i, w_f, b_f, w_o, b_o, w_p, b_p = params
    H = w_p.shape[0]
    D = w_g.shape[1] - H
    assert D == 1, "reference forward only supports input_dim == 1"
    assert batch_size == H, "reference bias broadcasting requires batch_size == num_hidden"
    BP = ((batch_size + 127) // 128) * 128          # lane-pad batch to 128

    f32 = jnp.float32
    gate_ws = (w_g, w_i, w_f, w_o)
    gate_bs = (b_g, b_i, b_f, b_o)

    wx = jnp.concatenate([w[:, :D] for w in gate_ws], axis=0).astype(f32)   # (4H, 1)
    wh = jnp.concatenate([w[:, D:] for w in gate_ws], axis=0).astype(f32)   # (4H, H)

    # Gate selector: row r picks bias row r // H out of the aug slab.  Together
    # with wx this makes  waug @ aug_t = wx * x_t + bias-per-batch-column,
    # reproducing the reference broadcasting quirk with zero in-kernel
    # broadcasts (bias[j] added to batch column j; valid because B == H).
    sel = jnp.repeat(jnp.eye(4, dtype=f32), H, axis=0)                      # (4H, 4)
    waug = jnp.concatenate([wx, sel, jnp.zeros((4 * H, 8 - 1 - 4), f32)],
                           axis=1)                                          # (4H, 8)

    # Pre-scale the sigmoid-gate rows by 0.5 so the kernel can run ONE
    # contiguous tanh over all four gates (sigmoid(z) = 0.5*tanh(0.5*z)+0.5).
    # Scaling waug's rows also scales the bias contribution, as required.
    row_scale = jnp.concatenate([jnp.ones((H, 1), f32),
                                 jnp.full((3 * H, 1), 0.5, f32)], axis=0)
    wh = wh * row_scale
    waug = waug * row_scale

    bm = jnp.stack([bb.astype(f32) for bb in gate_bs], axis=0)              # (4, B)
    bm = jnp.pad(bm, ((0, 0), (0, BP - batch_size)))                        # (4, BP), pad = 0

    bp_slab = jnp.tile(b_p.astype(f32)[:, None], (1, BP))                   # (H, BP)
    return (wh, waug, bm, w_p.astype(f32), bp_slab)


@jax.jit
def lstm_forward(x, packed):
    """x: (B, T) float32; packed: output of pack_params."""
    wh, waug, bm, wp, bp_slab = packed
    B, T = x.shape
    H = wp.shape[0]
    BP = bp_slab.shape[1]

    x_tm = jnp.transpose(x).astype(jnp.float32).reshape(T, 1, B)      # (T, 1, B)
    x_tm = jnp.pad(x_tm, ((0, 0), (0, 0), (0, BP - B)))               # (T, 1, BP)
    aug = jnp.concatenate(
        [x_tm,
         jnp.broadcast_to(bm[None], (T, 4, BP)),
         jnp.zeros((T, 3, BP), jnp.float32)], axis=1)                 # (T, 8, BP) ~ 32 KiB

    vmem = pl.BlockSpec(memory_space=pltpu.MemorySpace.VMEM)
    p = pl.pallas_call(
        lstm_kernel,
        out_shape=jax.ShapeDtypeStruct((H, BP), jnp.float32),
        in_specs=[vmem] * 5,
        out_specs=vmem,
    )(aug, wh, waug, wp, bp_slab)
    return p[:, :B].T                        # drop lane padding; permute(1, 0)


def lstm_ref(x, params):
    """Pure-JAX replica of the PyTorch forward (for verification)."""
    w_g, b_g, w_i, b_i, w_f, b_f, w_o, b_o, w_p, b_p = params
    B, T = x.shape
    H = w_p.shape[0]
    h = jnp.zeros((H, B), jnp.float32)
    c = jnp.zeros((H, B), jnp.float32)
    for t in range(T):
        hx = jnp.concatenate([x[:, t][None, :], h], axis=0)
        g = jnp.tanh(w_g @ hx + b_g)
        i = jax.nn.sigmoid(w_i @ hx + b_i)
        f = jax.nn.sigmoid(w_f @ hx + b_f)
        o = jax.nn.sigmoid(w_o @ hx + b_o)
        c = g * i + c * f
        h = jnp.tanh(c) * o
    return (w_p @ h + b_p[:, None]).T


if __name__ == "__main__":
    seq_length = 8
    input_dim = 1
    num_hidden = 32
    num_classes = 10          # unused by the reference forward's shapes
    batch_size = 32           # must equal num_hidden (reference broadcasting)

    key = jax.random.PRNGKey(0)
    ks = jax.random.split(key, 11)
    stdv = 1.0 / math.sqrt(num_hidden)

    def rn(k, *shape):
        return (stdv * jax.random.normal(k, shape)).astype(jnp.float32)

    params = (
        rn(ks[0], num_hidden, num_hidden + input_dim), rn(ks[1], num_hidden),   # w_g, b_g
        rn(ks[2], num_hidden, num_hidden + input_dim), rn(ks[3], num_hidden),   # w_i, b_i
        rn(ks[4], num_hidden, num_hidden + input_dim), rn(ks[5], num_hidden),   # w_f, b_f
        rn(ks[6], num_hidden, num_hidden + input_dim), rn(ks[7], num_hidden),   # w_o, b_o
        rn(ks[8], num_hidden, num_hidden), rn(ks[9], num_hidden),               # w_p, b_p
    )
    x = jax.random.normal(ks[10], (batch_size, seq_length), dtype=jnp.float32)

    packed = jax.block_until_ready(pack_params(params, batch_size))  # once, at setup
    out = jax.block_until_ready(lstm_forward(x, packed))
    ref = lstm_ref(x, params)
    assert out.shape == (batch_size, num_hidden)
    assert jnp.allclose(out, ref, atol=2e-5, rtol=2e-5), \
        float(jnp.max(jnp.abs(out - ref)))
    print("KERNEL_OK")
</pallas_src>

<mosaic_0001>
module attributes {stable_mosaic.version = 11 : i64} {
  func.func @lstm_kernel(%arg0: memref<8x8x128xf32, #tpu.memory_space<vmem>>, %arg1: memref<128x32xf32, #tpu.memory_space<vmem>>, %arg2: memref<128x8xf32, #tpu.memory_space<vmem>>, %arg3: memref<32x32xf32, #tpu.memory_space<vmem>>, %arg4: memref<32x128xf32, #tpu.memory_space<vmem>>, %arg5: memref<32x128xf32, #tpu.memory_space<vmem>>) attributes {dimension_semantics = [], scalar_prefetch = 0 : i64, scratch_operands = 0 : i64, tpu.core_type = #tpu.core_type<tc>} {
    %cst = arith.constant 0.000000e+00 : f32
    %0 = vector.broadcast %cst : f32 to vector<32x128xf32>
    %cst_0 = arith.constant 0.000000e+00 : f32
    %1 = vector.broadcast %cst_0 : f32 to vector<32x128xf32>
    %c0_i32 = arith.constant 0 : i32
    %c0 = arith.constant 0 : index
    %c0_1 = arith.constant 0 : index
    %2 = vector.load %arg1[%c0, %c0_1] : memref<128x32xf32, #tpu.memory_space<vmem>>, vector<128x32xf32>
    %cst_2 = arith.constant dense<0.000000e+00> : vector<128x128xf32>
    %3 = tpu.matmul %2, %0, %cst_2 {dimension_numbers = #tpu.dot_dimension_numbers<[1], [0], [0], [1], [0, 0, 1, 1], [], []>} : vector<128x32xf32>, vector<32x128xf32>, vector<128x128xf32> -> vector<128x128xf32>
    %c0_3 = arith.constant 0 : index
    %c0_4 = arith.constant 0 : index
    %4 = vector.load %arg2[%c0_3, %c0_4] : memref<128x8xf32, #tpu.memory_space<vmem>>, vector<128x8xf32>
    %5 = arith.index_cast %c0_i32 : i32 to index
    %c0_5 = arith.constant 0 : index
    %c0_6 = arith.constant 0 : index
    %6 = vector.load %arg0[%5, %c0_5, %c0_6] : memref<8x8x128xf32, #tpu.memory_space<vmem>>, vector<1x8x128xf32>
    %7 = vector.shape_cast %6 : vector<1x8x128xf32> to vector<8x128xf32>
    %cst_7 = arith.constant dense<0.000000e+00> : vector<128x128xf32>
    %8 = tpu.matmul %4, %7, %cst_7 {dimension_numbers = #tpu.dot_dimension_numbers<[1], [0], [0], [1], [0, 0, 1, 1], [], []>} : vector<128x8xf32>, vector<8x128xf32>, vector<128x128xf32> -> vector<128x128xf32>
    %9 = arith.addf %3, %8 : vector<128x128xf32>
    %10 = math.tanh %9 : vector<128x128xf32>
    %11 = vector.extract_strided_slice %10 {offsets = [0, 0], sizes = [32, 128], strides = [1, 1]} : vector<128x128xf32> to vector<32x128xf32>
    %12 = vector.extract_strided_slice %10 {offsets = [32, 0], sizes = [96, 128], strides = [1, 1]} : vector<128x128xf32> to vector<96x128xf32>
    %cst_8 = arith.constant 5.000000e-01 : f32
    %13 = vector.broadcast %cst_8 : f32 to vector<96x128xf32>
    %14 = arith.mulf %13, %12 : vector<96x128xf32>
    %cst_9 = arith.constant 5.000000e-01 : f32
    %15 = vector.broadcast %cst_9 : f32 to vector<96x128xf32>
    %16 = arith.addf %14, %15 : vector<96x128xf32>
    %17 = vector.extract_strided_slice %16 {offsets = [0, 0], sizes = [32, 128], strides = [1, 1]} : vector<96x128xf32> to vector<32x128xf32>
    %18 = vector.extract_strided_slice %16 {offsets = [32, 0], sizes = [32, 128], strides = [1, 1]} : vector<96x128xf32> to vector<32x128xf32>
    %19 = vector.extract_strided_slice %16 {offsets = [64, 0], sizes = [32, 128], strides = [1, 1]} : vector<96x128xf32> to vector<32x128xf32>
    %20 = arith.mulf %11, %17 : vector<32x128xf32>
    %21 = arith.mulf %1, %18 : vector<32x128xf32>
    %22 = arith.addf %20, %21 : vector<32x128xf32>
    %23 = math.tanh %22 : vector<32x128xf32>
    %24 = arith.mulf %23, %19 : vector<32x128xf32>
    %c1_i32 = arith.constant 1 : i32
    %c0_10 = arith.constant 0 : index
    %c0_11 = arith.constant 0 : index
    %25 = vector.load %arg1[%c0_10, %c0_11] : memref<128x32xf32, #tpu.memory_space<vmem>>, vector<128x32xf32>
    %cst_12 = arith.constant dense<0.000000e+00> : vector<128x128xf32>
    %26 = tpu.matmul %25, %24, %cst_12 {dimension_numbers = #tpu.dot_dimension_numbers<[1], [0], [0], [1], [0, 0, 1, 1], [], []>} : vector<128x32xf32>, vector<32x128xf32>, vector<128x128xf32> -> vector<128x128xf32>
    %c0_13 = arith.constant 0 : index
    %c0_14 = arith.constant 0 : index
    %27 = vector.load %arg2[%c0_13, %c0_14] : memref<128x8xf32, #tpu.memory_space<vmem>>, vector<128x8xf32>
    %28 = arith.index_cast %c1_i32 : i32 to index
    %c0_15 = arith.constant 0 : index
    %c0_16 = arith.constant 0 : index
    %29 = vector.load %arg0[%28, %c0_15, %c0_16] : memref<8x8x128xf32, #tpu.memory_space<vmem>>, vector<1x8x128xf32>
    %30 = vector.shape_cast %29 : vector<1x8x128xf32> to vector<8x128xf32>
    %cst_17 = arith.constant dense<0.000000e+00> : vector<128x128xf32>
    %31 = tpu.matmul %27, %30, %cst_17 {dimension_numbers = #tpu.dot_dimension_numbers<[1], [0], [0], [1], [0, 0, 1, 1], [], []>} : vector<128x8xf32>, vector<8x128xf32>, vector<128x128xf32> -> vector<128x128xf32>
    %32 = arith.addf %26, %31 : vector<128x128xf32>
    %33 = math.tanh %32 : vector<128x128xf32>
    %34 = vector.extract_strided_slice %33 {offsets = [0, 0], sizes = [32, 128], strides = [1, 1]} : vector<128x128xf32> to vector<32x128xf32>
    %35 = vector.extract_strided_slice %33 {offsets = [32, 0], sizes = [96, 128], strides = [1, 1]} : vector<128x128xf32> to vector<96x128xf32>
    %cst_18 = arith.constant 5.000000e-01 : f32
    %36 = vector.broadcast %cst_18 : f32 to vector<96x128xf32>
    %37 = arith.mulf %36, %35 : vector<96x128xf32>
    %cst_19 = arith.constant 5.000000e-01 : f32
    %38 = vector.broadcast %cst_19 : f32 to vector<96x128xf32>
    %39 = arith.addf %37, %38 : vector<96x128xf32>
    %40 = vector.extract_strided_slice %39 {offsets = [0, 0], sizes = [32, 128], strides = [1, 1]} : vector<96x128xf32> to vector<32x128xf32>
    %41 = vector.extract_strided_slice %39 {offsets = [32, 0], sizes = [32, 128], strides = [1, 1]} : vector<96x128xf32> to vector<32x128xf32>
    %42 = vector.extract_strided_slice %39 {offsets = [64, 0], sizes = [32, 128], strides = [1, 1]} : vector<96x128xf32> to vector<32x128xf32>
    %43 = arith.mulf %34, %40 : vector<32x128xf32>
    %44 = arith.mulf %22, %41 : vector<32x128xf32>
    %45 = arith.addf %43, %44 : vector<32x128xf32>
    %46 = math.tanh %45 : vector<32x128xf32>
    %47 = arith.mulf %46, %42 : vector<32x128xf32>
    %c2_i32 = arith.constant 2 : i32
    %c0_20 = arith.constant 0 : index
    %c0_21 = arith.constant 0 : index
    %48 = vector.load %arg1[%c0_20, %c0_21] : memref<128x32xf32, #tpu.memory_space<vmem>>, vector<128x32xf32>
    %cst_22 = arith.constant dense<0.000000e+00> : vector<128x128xf32>
    %49 = tpu.matmul %48, %47, %cst_22 {dimension_numbers = #tpu.dot_dimension_numbers<[1], [0], [0], [1], [0, 0, 1, 1], [], []>} : vector<128x32xf32>, vector<32x128xf32>, vector<128x128xf32> -> vector<128x128xf32>
    %c0_23 = arith.constant 0 : index
    %c0_24 = arith.constant 0 : index
    %50 = vector.load %arg2[%c0_23, %c0_24] : memref<128x8xf32, #tpu.memory_space<vmem>>, vector<128x8xf32>
    %51 = arith.index_cast %c2_i32 : i32 to index
    %c0_25 = arith.constant 0 : index
    %c0_26 = arith.constant 0 : index
    %52 = vector.load %arg0[%51, %c0_25, %c0_26] : memref<8x8x128xf32, #tpu.memory_space<vmem>>, vector<1x8x128xf32>
    %53 = vector.shape_cast %52 : vector<1x8x128xf32> to vector<8x128xf32>
    %cst_27 = arith.constant dense<0.000000e+00> : vector<128x128xf32>
    %54 = tpu.matmul %50, %53, %cst_27 {dimension_numbers = #tpu.dot_dimension_numbers<[1], [0], [0], [1], [0, 0, 1, 1], [], []>} : vector<128x8xf32>, vector<8x128xf32>, vector<128x128xf32> -> vector<128x128xf32>
    %55 = arith.addf %49, %54 : vector<128x128xf32>
    %56 = math.tanh %55 : vector<128x128xf32>
    %57 = vector.extract_strided_slice %56 {offsets = [0, 0], sizes = [32, 128], strides = [1, 1]} : vector<128x128xf32> to vector<32x128xf32>
    %58 = vector.extract_strided_slice %56 {offsets = [32, 0], sizes = [96, 128], strides = [1, 1]} : vector<128x128xf32> to vector<96x128xf32>
    %cst_28 = arith.constant 5.000000e-01 : f32
    %59 = vector.broadcast %cst_28 : f32 to vector<96x128xf32>
    %60 = arith.mulf %59, %58 : vector<96x128xf32>
    %cst_29 = arith.constant 5.000000e-01 : f32
    %61 = vector.broadcast %cst_29 : f32 to vector<96x128xf32>
    %62 = arith.addf %60, %61 : vector<96x128xf32>
    %63 = vector.extract_strided_slice %62 {offsets = [0, 0], sizes = [32, 128], strides = [1, 1]} : vector<96x128xf32> to vector<32x128xf32>
    %64 = vector.extract_strided_slice %62 {offsets = [32, 0], sizes = [32, 128], strides = [1, 1]} : vector<96x128xf32> to vector<32x128xf32>
    %65 = vector.extract_strided_slice %62 {offsets = [64, 0], sizes = [32, 128], strides = [1, 1]} : vector<96x128xf32> to vector<32x128xf32>
    %66 = arith.mulf %57, %63 : vector<32x128xf32>
    %67 = arith.mulf %45, %64 : vector<32x128xf32>
    %68 = arith.addf %66, %67 : vector<32x128xf32>
    %69 = math.tanh %68 : vector<32x128xf32>
    %70 = arith.mulf %69, %65 : vector<32x128xf32>
    %c3_i32 = arith.constant 3 : i32
    %c0_30 = arith.constant 0 : index
    %c0_31 = arith.constant 0 : index
    %71 = vector.load %arg1[%c0_30, %c0_31] : memref<128x32xf32, #tpu.memory_space<vmem>>, vector<128x32xf32>
    %cst_32 = arith.constant dense<0.000000e+00> : vector<128x128xf32>
    %72 = tpu.matmul %71, %70, %cst_32 {dimension_numbers = #tpu.dot_dimension_numbers<[1], [0], [0], [1], [0, 0, 1, 1], [], []>} : vector<128x32xf32>, vector<32x128xf32>, vector<128x128xf32> -> vector<128x128xf32>
    %c0_33 = arith.constant 0 : index
    %c0_34 = arith.constant 0 : index
    %73 = vector.load %arg2[%c0_33, %c0_34] : memref<128x8xf32, #tpu.memory_space<vmem>>, vector<128x8xf32>
    %74 = arith.index_cast %c3_i32 : i32 to index
    %c0_35 = arith.constant 0 : index
    %c0_36 = arith.constant 0 : index
    %75 = vector.load %arg0[%74, %c0_35, %c0_36] : memref<8x8x128xf32, #tpu.memory_space<vmem>>, vector<1x8x128xf32>
    %76 = vector.shape_cast %75 : vector<1x8x128xf32> to vector<8x128xf32>
    %cst_37 = arith.constant dense<0.000000e+00> : vector<128x128xf32>
    %77 = tpu.matmul %73, %76, %cst_37 {dimension_numbers = #tpu.dot_dimension_numbers<[1], [0], [0], [1], [0, 0, 1, 1], [], []>} : vector<128x8xf32>, vector<8x128xf32>, vector<128x128xf32> -> vector<128x128xf32>
    %78 = arith.addf %72, %77 : vector<128x128xf32>
    %79 = math.tanh %78 : vector<128x128xf32>
    %80 = vector.extract_strided_slice %79 {offsets = [0, 0], sizes = [32, 128], strides = [1, 1]} : vector<128x128xf32> to vector<32x128xf32>
    %81 = vector.extract_strided_slice %79 {offsets = [32, 0], sizes = [96, 128], strides = [1, 1]} : vector<128x128xf32> to vector<96x128xf32>
    %cst_38 = arith.constant 5.000000e-01 : f32
    %82 = vector.broadcast %cst_38 : f32 to vector<96x128xf32>
    %83 = arith.mulf %82, %81 : vector<96x128xf32>
    %cst_39 = arith.constant 5.000000e-01 : f32
    %84 = vector.broadcast %cst_39 : f32 to vector<96x128xf32>
    %85 = arith.addf %83, %84 : vector<96x128xf32>
    %86 = vector.extract_strided_slice %85 {offsets = [0, 0], sizes = [32, 128], strides = [1, 1]} : vector<96x128xf32> to vector<32x128xf32>
    %87 = vector.extract_strided_slice %85 {offsets = [32, 0], sizes = [32, 128], strides = [1, 1]} : vector<96x128xf32> to vector<32x128xf32>
    %88 = vector.extract_strided_slice %85 {offsets = [64, 0], sizes = [32, 128], strides = [1, 1]} : vector<96x128xf32> to vector<32x128xf32>
    %89 = arith.mulf %80, %86 : vector<32x128xf32>
    %90 = arith.mulf %68, %87 : vector<32x128xf32>
    %91 = arith.addf %89, %90 : vector<32x128xf32>
    %92 = math.tanh %91 : vector<32x128xf32>
    %93 = arith.mulf %92, %88 : vector<32x128xf32>
    %c4_i32 = arith.constant 4 : i32
    %c0_40 = arith.constant 0 : index
    %c0_41 = arith.constant 0 : index
    %94 = vector.load %arg1[%c0_40, %c0_41] : memref<128x32xf32, #tpu.memory_space<vmem>>, vector<128x32xf32>
    %cst_42 = arith.constant dense<0.000000e+00> : vector<128x128xf32>
    %95 = tpu.matmul %94, %93, %cst_42 {dimension_numbers = #tpu.dot_dimension_numbers<[1], [0], [0], [1], [0, 0, 1, 1], [], []>} : vector<128x32xf32>, vector<32x128xf32>, vector<128x128xf32> -> vector<128x128xf32>
    %c0_43 = arith.constant 0 : index
    %c0_44 = arith.constant 0 : index
    %96 = vector.load %arg2[%c0_43, %c0_44] : memref<128x8xf32, #tpu.memory_space<vmem>>, vector<128x8xf32>
    %97 = arith.index_cast %c4_i32 : i32 to index
    %c0_45 = arith.constant 0 : index
    %c0_46 = arith.constant 0 : index
    %98 = vector.load %arg0[%97, %c0_45, %c0_46] : memref<8x8x128xf32, #tpu.memory_space<vmem>>, vector<1x8x128xf32>
    %99 = vector.shape_cast %98 : vector<1x8x128xf32> to vector<8x128xf32>
    %cst_47 = arith.constant dense<0.000000e+00> : vector<128x128xf32>
    %100 = tpu.matmul %96, %99, %cst_47 {dimension_numbers = #tpu.dot_dimension_numbers<[1], [0], [0], [1], [0, 0, 1, 1], [], []>} : vector<128x8xf32>, vector<8x128xf32>, vector<128x128xf32> -> vector<128x128xf32>
    %101 = arith.addf %95, %100 : vector<128x128xf32>
    %102 = math.tanh %101 : vector<128x128xf32>
    %103 = vector.extract_strided_slice %102 {offsets = [0, 0], sizes = [32, 128], strides = [1, 1]} : vector<128x128xf32> to vector<32x128xf32>
    %104 = vector.extract_strided_slice %102 {offsets = [32, 0], sizes = [96, 128], strides = [1, 1]} : vector<128x128xf32> to vector<96x128xf32>
    %cst_48 = arith.constant 5.000000e-01 : f32
    %105 = vector.broadcast %cst_48 : f32 to vector<96x128xf32>
    %106 = arith.mulf %105, %104 : vector<96x128xf32>
    %cst_49 = arith.constant 5.000000e-01 : f32
    %107 = vector.broadcast %cst_49 : f32 to vector<96x128xf32>
    %108 = arith.addf %106, %107 : vector<96x128xf32>
    %109 = vector.extract_strided_slice %108 {offsets = [0, 0], sizes = [32, 128], strides = [1, 1]} : vector<96x128xf32> to vector<32x128xf32>
    %110 = vector.extract_strided_slice %108 {offsets = [32, 0], sizes = [32, 128], strides = [1, 1]} : vector<96x128xf32> to vector<32x128xf32>
    %111 = vector.extract_strided_slice %108 {offsets = [64, 0], sizes = [32, 128], strides = [1, 1]} : vector<96x128xf32> to vector<32x128xf32>
    %112 = arith.mulf %103, %109 : vector<32x128xf32>
    %113 = arith.mulf %91, %110 : vector<32x128xf32>
    %114 = arith.addf %112, %113 : vector<32x128xf32>
    %115 = math.tanh %114 : vector<32x128xf32>
    %116 = arith.mulf %115, %111 : vector<32x128xf32>
    %c5_i32 = arith.constant 5 : i32
    %c0_50 = arith.constant 0 : index
    %c0_51 = arith.constant 0 : index
    %117 = vector.load %arg1[%c0_50, %c0_51] : memref<128x32xf32, #tpu.memory_space<vmem>>, vector<128x32xf32>
    %cst_52 = arith.constant dense<0.000000e+00> : vector<128x128xf32>
    %118 = tpu.matmul %117, %116, %cst_52 {dimension_numbers = #tpu.dot_dimension_numbers<[1], [0], [0], [1], [0, 0, 1, 1], [], []>} : vector<128x32xf32>, vector<32x128xf32>, vector<128x128xf32> -> vector<128x128xf32>
    %c0_53 = arith.constant 0 : index
    %c0_54 = arith.constant 0 : index
    %119 = vector.load %arg2[%c0_53, %c0_54] : memref<128x8xf32, #tpu.memory_space<vmem>>, vector<128x8xf32>
    %120 = arith.index_cast %c5_i32 : i32 to index
    %c0_55 = arith.constant 0 : index
    %c0_56 = arith.constant 0 : index
    %121 = vector.load %arg0[%120, %c0_55, %c0_56] : memref<8x8x128xf32, #tpu.memory_space<vmem>>, vector<1x8x128xf32>
    %122 = vector.shape_cast %121 : vector<1x8x128xf32> to vector<8x128xf32>
    %cst_57 = arith.constant dense<0.000000e+00> : vector<128x128xf32>
    %123 = tpu.matmul %119, %122, %cst_57 {dimension_numbers = #tpu.dot_dimension_numbers<[1], [0], [0], [1], [0, 0, 1, 1], [], []>} : vector<128x8xf32>, vector<8x128xf32>, vector<128x128xf32> -> vector<128x128xf32>
    %124 = arith.addf %118, %123 : vector<128x128xf32>
    %125 = math.tanh %124 : vector<128x128xf32>
    %126 = vector.extract_strided_slice %125 {offsets = [0, 0], sizes = [32, 128], strides = [1, 1]} : vector<128x128xf32> to vector<32x128xf32>
    %127 = vector.extract_strided_slice %125 {offsets = [32, 0], sizes = [96, 128], strides = [1, 1]} : vector<128x128xf32> to vector<96x128xf32>
    %cst_58 = arith.constant 5.000000e-01 : f32
    %128 = vector.broadcast %cst_58 : f32 to vector<96x128xf32>
    %129 = arith.mulf %128, %127 : vector<96x128xf32>
    %cst_59 = arith.constant 5.000000e-01 : f32
    %130 = vector.broadcast %cst_59 : f32 to vector<96x128xf32>
    %131 = arith.addf %129, %130 : vector<96x128xf32>
    %132 = vector.extract_strided_slice %131 {offsets = [0, 0], sizes = [32, 128], strides = [1, 1]} : vector<96x128xf32> to vector<32x128xf32>
    %133 = vector.extract_strided_slice %131 {offsets = [32, 0], sizes = [32, 128], strides = [1, 1]} : vector<96x128xf32> to vector<32x128xf32>
    %134 = vector.extract_strided_slice %131 {offsets = [64, 0], sizes = [32, 128], strides = [1, 1]} : vector<96x128xf32> to vector<32x128xf32>
    %135 = arith.mulf %126, %132 : vector<32x128xf32>
    %136 = arith.mulf %114, %133 : vector<32x128xf32>
    %137 = arith.addf %135, %136 : vector<32x128xf32>
    %138 = math.tanh %137 : vector<32x128xf32>
    %139 = arith.mulf %138, %134 : vector<32x128xf32>
    %c6_i32 = arith.constant 6 : i32
    %c0_60 = arith.constant 0 : index
    %c0_61 = arith.constant 0 : index
    %140 = vector.load %arg1[%c0_60, %c0_61] : memref<128x32xf32, #tpu.memory_space<vmem>>, vector<128x32xf32>
    %cst_62 = arith.constant dense<0.000000e+00> : vector<128x128xf32>
    %141 = tpu.matmul %140, %139, %cst_62 {dimension_numbers = #tpu.dot_dimension_numbers<[1], [0], [0], [1], [0, 0, 1, 1], [], []>} : vector<128x32xf32>, vector<32x128xf32>, vector<128x128xf32> -> vector<128x128xf32>
    %c0_63 = arith.constant 0 : index
    %c0_64 = arith.constant 0 : index
    %142 = vector.load %arg2[%c0_63, %c0_64] : memref<128x8xf32, #tpu.memory_space<vmem>>, vector<128x8xf32>
    %143 = arith.index_cast %c6_i32 : i32 to index
    %c0_65 = arith.constant 0 : index
    %c0_66 = arith.constant 0 : index
    %144 = vector.load %arg0[%143, %c0_65, %c0_66] : memref<8x8x128xf32, #tpu.memory_space<vmem>>, vector<1x8x128xf32>
    %145 = vector.shape_cast %144 : vector<1x8x128xf32> to vector<8x128xf32>
    %cst_67 = arith.constant dense<0.000000e+00> : vector<128x128xf32>
    %146 = tpu.matmul %142, %145, %cst_67 {dimension_numbers = #tpu.dot_dimension_numbers<[1], [0], [0], [1], [0, 0, 1, 1], [], []>} : vector<128x8xf32>, vector<8x128xf32>, vector<128x128xf32> -> vector<128x128xf32>
    %147 = arith.addf %141, %146 : vector<128x128xf32>
    %148 = math.tanh %147 : vector<128x128xf32>
    %149 = vector.extract_strided_slice %148 {offsets = [0, 0], sizes = [32, 128], strides = [1, 1]} : vector<128x128xf32> to vector<32x128xf32>
    %150 = vector.extract_strided_slice %148 {offsets = [32, 0], sizes = [96, 128], strides = [1, 1]} : vector<128x128xf32> to vector<96x128xf32>
    %cst_68 = arith.constant 5.000000e-01 : f32
    %151 = vector.broadcast %cst_68 : f32 to vector<96x128xf32>
    %152 = arith.mulf %151, %150 : vector<96x128xf32>
    %cst_69 = arith.constant 5.000000e-01 : f32
    %153 = vector.broadcast %cst_69 : f32 to vector<96x128xf32>
    %154 = arith.addf %152, %153 : vector<96x128xf32>
    %155 = vector.extract_strided_slice %154 {offsets = [0, 0], sizes = [32, 128], strides = [1, 1]} : vector<96x128xf32> to vector<32x128xf32>
    %156 = vector.extract_strided_slice %154 {offsets = [32, 0], sizes = [32, 128], strides = [1, 1]} : vector<96x128xf32> to vector<32x128xf32>
    %157 = vector.extract_strided_slice %154 {offsets = [64, 0], sizes = [32, 128], strides = [1, 1]} : vector<96x128xf32> to vector<32x128xf32>
    %158 = arith.mulf %149, %155 : vector<32x128xf32>
    %159 = arith.mulf %137, %156 : vector<32x128xf32>
    %160 = arith.addf %158, %159 : vector<32x128xf32>
    %161 = math.tanh %160 : vector<32x128xf32>
    %162 = arith.mulf %161, %157 : vector<32x128xf32>
    %c7_i32 = arith.constant 7 : i32
    %c0_70 = arith.constant 0 : index
    %c0_71 = arith.constant 0 : index
    %163 = vector.load %arg1[%c0_70, %c0_71] : memref<128x32xf32, #tpu.memory_space<vmem>>, vector<128x32xf32>
    %cst_72 = arith.constant dense<0.000000e+00> : vector<128x128xf32>
    %164 = tpu.matmul %163, %162, %cst_72 {dimension_numbers = #tpu.dot_dimension_numbers<[1], [0], [0], [1], [0, 0, 1, 1], [], []>} : vector<128x32xf32>, vector<32x128xf32>, vector<128x128xf32> -> vector<128x128xf32>
    %c0_73 = arith.constant 0 : index
    %c0_74 = arith.constant 0 : index
    %165 = vector.load %arg2[%c0_73, %c0_74] : memref<128x8xf32, #tpu.memory_space<vmem>>, vector<128x8xf32>
    %166 = arith.index_cast %c7_i32 : i32 to index
    %c0_75 = arith.constant 0 : index
    %c0_76 = arith.constant 0 : index
    %167 = vector.load %arg0[%166, %c0_75, %c0_76] : memref<8x8x128xf32, #tpu.memory_space<vmem>>, vector<1x8x128xf32>
    %168 = vector.shape_cast %167 : vector<1x8x128xf32> to vector<8x128xf32>
    %cst_77 = arith.constant dense<0.000000e+00> : vector<128x128xf32>
    %169 = tpu.matmul %165, %168, %cst_77 {dimension_numbers = #tpu.dot_dimension_numbers<[1], [0], [0], [1], [0, 0, 1, 1], [], []>} : vector<128x8xf32>, vector<8x128xf32>, vector<128x128xf32> -> vector<128x128xf32>
    %170 = arith.addf %164, %169 : vector<128x128xf32>
    %171 = math.tanh %170 : vector<128x128xf32>
    %172 = vector.extract_strided_slice %171 {offsets = [0, 0], sizes = [32, 128], strides = [1, 1]} : vector<128x128xf32> to vector<32x128xf32>
    %173 = vector.extract_strided_slice %171 {offsets = [32, 0], sizes = [96, 128], strides = [1, 1]} : vector<128x128xf32> to vector<96x128xf32>
    %cst_78 = arith.constant 5.000000e-01 : f32
    %174 = vector.broadcast %cst_78 : f32 to vector<96x128xf32>
    %175 = arith.mulf %174, %173 : vector<96x128xf32>
    %cst_79 = arith.constant 5.000000e-01 : f32
    %176 = vector.broadcast %cst_79 : f32 to vector<96x128xf32>
    %177 = arith.addf %175, %176 : vector<96x128xf32>
    %178 = vector.extract_strided_slice %177 {offsets = [0, 0], sizes = [32, 128], strides = [1, 1]} : vector<96x128xf32> to vector<32x128xf32>
    %179 = vector.extract_strided_slice %177 {offsets = [32, 0], sizes = [32, 128], strides = [1, 1]} : vector<96x128xf32> to vector<32x128xf32>
    %180 = vector.extract_strided_slice %177 {offsets = [64, 0], sizes = [32, 128], strides = [1, 1]} : vector<96x128xf32> to vector<32x128xf32>
    %181 = arith.mulf %172, %178 : vector<32x128xf32>
    %182 = arith.mulf %160, %179 : vector<32x128xf32>
    %183 = arith.addf %181, %182 : vector<32x128xf32>
    %184 = math.tanh %183 : vector<32x128xf32>
    %185 = arith.mulf %184, %180 : vector<32x128xf32>
    %c8_i32 = arith.constant 8 : i32
    %c0_80 = arith.constant 0 : index
    %c0_81 = arith.constant 0 : index
    %186 = vector.load %arg3[%c0_80, %c0_81] : memref<32x32xf32, #tpu.memory_space<vmem>>, vector<32x32xf32>
    %cst_82 = arith.constant dense<0.000000e+00> : vector<32x128xf32>
    %187 = tpu.matmul %186, %185, %cst_82 {dimension_numbers = #tpu.dot_dimension_numbers<[1], [0], [0], [1], [0, 0, 1, 1], [], []>} : vector<32x32xf32>, vector<32x128xf32>, vector<32x128xf32> -> vector<32x128xf32>
    %c0_83 = arith.constant 0 : index
    %c0_84 = arith.constant 0 : index
    %188 = vector.load %arg4[%c0_83, %c0_84] : memref<32x128xf32, #tpu.memory_space<vmem>>, vector<32x128xf32>
    %189 = arith.addf %187, %188 : vector<32x128xf32>
    %c0_85 = arith.constant 0 : index
    %c0_86 = arith.constant 0 : index
    %190 = vector.load %arg5[%c0_85, %c0_86] : memref<32x128xf32, #tpu.memory_space<vmem>>, vector<32x128xf32>
    tpu.vector_store %arg5[%c0_85, %c0_86], %189 {strides = array<i32>} : memref<32x128xf32, #tpu.memory_space<vmem>>, vector<32x128xf32>,
    return
  }
}

</mosaic_0001>

<bundles_post_ra>
// kernel: lstm_forward.1
= control target key start
LH: loop header
LB: loop body
LE: loop exit
PB: predicated region body
PF: predicated region fallthrough
CT: control target
= control target key end

     0   :  { %vm53_vm0 = vcmask 64512   ;;  %v4665_v4 = vmov 0.0   ;;  %vm247_vm1 = vcmask 261120   ;;  %s5704_s0 = inlined_call_operand.vmem [shape: f32[8,8,128], index: 0, kind: input, shape index: {}]   ;;  %s5705_s2 = inlined_call_operand.vmem [shape: f32[128,8], index: 2, kind: input, shape index: {}]   ;;  %s5706_s1 = inlined_call_operand.vmem [shape: f32[128,32], index: 1, kind: input, shape index: {}]   ;;  %s5707_s3 = inlined_call_operand.vmem [shape: f32[32,32], index: 3, kind: input, shape index: {}]   ;;  %s5708_s4 = inlined_call_operand.vmem [shape: f32[32,128], index: 4, kind: input, shape index: {}]   ;;  %s5709_s5 = inlined_call_operand.vmem [shape: f32[32,128], index: 5, kind: output, shape index: {}]  }
   0x1   :  { %v52_v0 = vld [vmem:[%s5704_s0] sm:$0xff]  ;;  %v4707_v2 = vld [vmem:[%s5705_s2 + $0x8] sm:$0xff]  ;;  %v4714_v3 = vld [vmem:[%s5705_s2 + $0x10] sm:$0xff] }
   0x2   :  { %v4702_v1 = vld [vmem:[%s5705_s2] sm:$0xff]  ;;  %3646 = vmatprep.subr.mxu0 %v52_v0  ;;  %4182 = vmatprep.subr.mxu1 %v52_v0  ;;  %v4723_v5 = vld [vmem:[%s5705_s2 + $0x18] sm:$0xff]  ;;  %v4737_v7 = vld [vmem:[%s5705_s2 + $0x28] sm:$0xff] }
   0x3   :  { %3648 = vmatprep.mubr.msk.f32.mxu0 %vm53_vm0, %v4702_v1  ;;  %3647 = vmatpush3.msra.mxu0 %v52_v0  ;;  %v4728_v6 = vld [vmem:[%s5705_s2 + $0x20] sm:$0xff]  ;;  %v4742_v8 = vld [vmem:[%s5705_s2 + $0x30] sm:$0xff]  ;;  %v4754_v10 = vld [vmem:[%s5705_s2 + $0x78] sm:$0xff] }
   0x4   :  { %3649 = vmatmul.mubr.msk.f32.vlgmr.msra.gmra.mrb[0].mxu0 %vm53_vm0, %v4707_v2  ;;  %3672 = vmatprep.subr.mxu0 %v4665_v4  ;;  %v4747_v9 = vld [vmem:[%s5705_s2 + $0x70] sm:$0xff]  ;;  %v4765_v11 = vld [vmem:[%s5705_s2 + $0x38] sm:$0xff]  ;;  %v4772_v12 = vld [vmem:[%s5705_s2 + $0x40] sm:$0xff] }
   0x5   :  { %3651 = vmatprep.mubr.msk.f32.mxu0 %vm53_vm0, %v4714_v3  ;;  %3673 = vmatpush3.msra.mxu0 %v4665_v4  ;;  %v4781_v13 = vld [vmem:[%s5705_s2 + $0x48] sm:$0xff]  ;;  %v4786_v14 = vld [vmem:[%s5705_s2 + $0x50] sm:$0xff]  ;;  %v4795_v15 = vld [vmem:[%s5705_s2 + $0x58] sm:$0xff] }
   0x6   :  { %4183 = vmatpush3.msra.mxu1 %v52_v0  ;;  %3669 = vmatprep.mubr.msk.f32.mxu1 %vm53_vm0, %v4747_v9  ;;  %v4800_v16 = vld [vmem:[%s5705_s2 + $0x60] sm:$0xff]  ;;  %v4809_v17 = vld [vmem:[%s5705_s2 + $0x68] sm:$0xff]  ;;  %v4828_v20 = vld [vmem:[%s5706_s1 + $0x10] sm:$0xff] }
   0x7   :  { %3670 = vmatmul.mubr.msk.f32.vlgmr.msra.gmra.mrb[0].mxu1 %vm53_vm0, %v4754_v10  ;;  %v4814_v18 = vld [vmem:[%s5706_s1] sm:$0xff]  ;;  %v4823_v19 = vld [vmem:[%s5706_s1 + $0x8] sm:$0xff]  ;;  %v4837_v21 = vld [vmem:[%s5706_s1 + $0x18] sm:$0xff] }
   0x8   :  { %3652 = vmatmul.mubr.msk.f32.gmra.mrb[2].mxu0 %vm53_vm0, %v4723_v5  ;;  %3700 = vmatprep.mubr.msk.f32.mxu1 %vm53_vm0, %v4702_v1  ;;  %v4842_v22 = vld [vmem:[%s5706_s1 + $0x20] sm:$0xff]  ;;  %v4851_v23 = vld [vmem:[%s5706_s1 + $0x28] sm:$0xff]  ;;  %v4856_v24 = vld [vmem:[%s5706_s1 + $0x30] sm:$0xff] }
   0x9   :  { %3654 = vmatprep.mubr.msk.f32.mxu0 %vm53_vm0, %v4728_v6  ;;  %v4865_v25 = vld [vmem:[%s5706_s1 + $0x38] sm:$0xff]  ;;  %v4870_v26 = vld [vmem:[%s5706_s1 + $0x40] sm:$0xff]  ;;  %v4879_v27 = vld [vmem:[%s5706_s1 + $0x48] sm:$0xff] }
   0xa   :  { %v4884_v28 = vld [vmem:[%s5706_s1 + $0x50] sm:$0xff]  ;;  %v4893_v29 = vld [vmem:[%s5706_s1 + $0x58] sm:$0xff]  ;;  %v4898_v30 = vld [vmem:[%s5706_s1 + $0x60] sm:$0xff] }
   0xb   :  { %v4907_v31 = vld [vmem:[%s5706_s1 + $0x68] sm:$0xff]  ;;  %v4912_v32 = vld [vmem:[%s5706_s1 + $0x70] sm:$0xff]  ;;  %v4921_v33 = vld [vmem:[%s5706_s1 + $0x78] sm:$0xff] }
   0xc   :  { %3655 = vmatmul.mubr.msk.f32.gmra.mrb[4].mxu0 %vm53_vm0, %v4737_v7  ;;  %v3110_v34 = vld [vmem:[%s5704_s0 + $0x8] sm:$0xff] }
   0xd   :  { %3657 = vmatprep.mubr.msk.f32.mxu0 %vm53_vm0, %v4742_v8  ;;  %3698 = vmatprep.subr.mxu1 %v3110_v34 }
   0xe   :  { %3699 = vmatpush3.msra.mxu1 %v3110_v34 }
   0xf   :  { %3701 = vmatmul.mubr.msk.f32.vlgmr.msra.gmra.mrb[2].mxu1 %vm53_vm0, %v4707_v2 }
  0x10   :  { %3658 = vmatmul.mubr.msk.f32.gmra.mrb[6].mxu0 %vm53_vm0, %v4765_v11  ;;  %3703 = vmatprep.mubr.msk.f32.mxu1 %vm53_vm0, %v4714_v3 }
  0x11   :  { %3660 = vmatprep.mubr.msk.f32.mxu0 %vm53_vm0, %v4772_v12 }
  0x13   :  { %3704 = vmatmul.mubr.msk.f32.gmra.mrb[4].mxu1 %vm53_vm0, %v4723_v5 }
  0x14   :  { %3661 = vmatmul.mubr.msk.f32.gmra.mrb[8].mxu0 %vm53_vm0, %v4781_v13  ;;  %3706 = vmatprep.mubr.msk.f32.mxu1 %vm53_vm0, %v4728_v6 }
  0x15   :  { %3663 = vmatprep.mubr.msk.f32.mxu0 %vm53_vm0, %v4786_v14 }
  0x17   :  { %3707 = vmatmul.mubr.msk.f32.gmra.mrb[6].mxu1 %vm53_vm0, %v4737_v7 }
  0x18   :  { %3664 = vmatmul.mubr.msk.f32.gmra.mrb[10].mxu0 %vm53_vm0, %v4795_v15  ;;  %3709 = vmatprep.mubr.msk.f32.mxu1 %vm53_vm0, %v4742_v8 }
  0x19   :  { %3666 = vmatprep.mubr.msk.f32.mxu0 %vm53_vm0, %v4800_v16 }
  0x1b   :  { %3710 = vmatmul.mubr.msk.f32.gmra.mrb[8].mxu1 %vm53_vm0, %v4765_v11 }
  0x1c   :  { %3667 = vmatmul.mubr.msk.f32.gmra.mrb[12].mxu0 %vm53_vm0, %v4809_v17  ;;  %3712 = vmatprep.mubr.msk.f32.mxu1 %vm53_vm0, %v4772_v12 }
  0x1d   :  { %3674 = vmatprep.mubr.msk.f32.mxu0 %vm247_vm1, %v4814_v18 }
  0x1f   :  { %3713 = vmatmul.mubr.msk.f32.gmra.mrb[10].mxu1 %vm53_vm0, %v4781_v13 }
  0x20   :  { %3675 = vmatmul.mubr.msk.f32.vlgmr.msra.gmra.mrb[0].mxu0 %vm247_vm1, %v4823_v19  ;;  %3715 = vmatprep.mubr.msk.f32.mxu1 %vm53_vm0, %v4786_v14 }
  0x21   :  { %3677 = vmatprep.mubr.msk.f32.mxu0 %vm247_vm1, %v4828_v20 }
  0x23   :  { %3716 = vmatmul.mubr.msk.f32.gmra.mrb[12].mxu1 %vm53_vm0, %v4795_v15 }
  0x24   :  { %3678 = vmatmul.mubr.msk.f32.gmra.mrb[2].mxu0 %vm247_vm1, %v4837_v21  ;;  %3718 = vmatprep.mubr.msk.f32.mxu1 %vm53_vm0, %v4800_v16 }
  0x25   :  { %3680 = vmatprep.mubr.msk.f32.mxu0 %vm247_vm1, %v4842_v22 }
  0x27   :  { %3719 = vmatmul.mubr.msk.f32.gmra.mrb[14].mxu1 %vm53_vm0, %v4809_v17 }
  0x28   :  { %3681 = vmatmul.mubr.msk.f32.gmra.mrb[4].mxu0 %vm247_vm1, %v4851_v23  ;;  %3721 = vmatprep.mubr.msk.f32.mxu1 %vm53_vm0, %v4747_v9 }
  0x29   :  { %3683 = vmatprep.mubr.msk.f32.mxu0 %vm247_vm1, %v4856_v24 }
  0x2b   :  { %3722 = vmatmul.mubr.msk.f32.gmra.mrb[16].mxu1 %vm53_vm0, %v4754_v10 }
  0x2c   :  { %3684 = vmatmul.mubr.msk.f32.gmra.mrb[6].mxu0 %vm247_vm1, %v4865_v25  ;;  %3732 = vmatprep.mubr.msk.f32.mxu1 %vm247_vm1, %v4814_v18 }
  0x2d   :  { %3686 = vmatprep.mubr.msk.f32.mxu0 %vm247_vm1, %v4870_v26 }
  0x30   :  { %3687 = vmatmul.mubr.msk.f32.gmra.mrb[8].mxu0 %vm247_vm1, %v4879_v27 }
  0x31   :  { %3689 = vmatprep.mubr.msk.f32.mxu0 %vm247_vm1, %v4884_v28 }
  0x34   :  { %3690 = vmatmul.mubr.msk.f32.gmra.mrb[10].mxu0 %vm247_vm1, %v4893_v29 }
  0x35   :  { %3692 = vmatprep.mubr.msk.f32.mxu0 %vm247_vm1, %v4898_v30 }
  0x38   :  { %3693 = vmatmul.mubr.msk.f32.gmra.mrb[12].mxu0 %vm247_vm1, %v4907_v31 }
  0x39   :  { %3695 = vmatprep.mubr.msk.f32.mxu0 %vm247_vm1, %v4912_v32 }
  0x3c   :  { %3696 = vmatmul.mubr.msk.f32.gmra.mrb[14].mxu0 %vm247_vm1, %v4921_v33 }
  0x3d   :  { %3758 = vmatprep.mubr.msk.f32.mxu0 %vm53_vm0, %v4702_v1 }
  0xda   :  { %v3671_v35 = vpop.f32.mrb[0].mxu1 }
  0xdb   :  { %v238_v36 = vpop.f32.mrb[1].mxu1 }
  0xf3   :  { %v3676_v37 = vpop.f32.mrb[0].mxu0 }
  0xf4   :  { %v362_v38 = vpop.f32.mrb[1].mxu0 }
  0xf7   :  { %v3679_v39 = vpop.f32.mrb[2].mxu0 }
  0xf8   :  { %v372_v40 = vpop.f32.mrb[3].mxu0 }
  0xfb   :  { %v3682_v41 = vpop.f32.mrb[4].mxu0 }
  0xfc   :  { %4313 = vtanh.f32 %v3682_v41  ;;  %v382_v42 = vpop.f32.mrb[5].mxu0 }
  0xfd   :  { %4315 = vtanh.f32 %v382_v42 }
  0xfe   :  { %4317 = vtanh.f32 %v3676_v37 }
  0xff   :  { %4319 = vtanh.f32 %v362_v38  ;;  %v3685_v43 = vpop.f32.mrb[6].mxu0 }
 0x100   :  { %4321 = vtanh.f32 %v3685_v43  ;;  %v392_v44 = vpop.f32.mrb[7].mxu0 }
 0x101   :  { %4323 = vtanh.f32 %v392_v44 }
 0x102   :  { %4325 = vtanh.f32 %v3679_v39 }
 0x103   :  { %4327 = vtanh.f32 %v372_v40  ;;  %v3688_v45 = vpop.f32.mrb[8].mxu0 }
 0x104   :  { %4329 = vtanh.f32 %v3688_v45  ;;  %v402_v46 = vpop.f32.mrb[9].mxu0 }
 0x105   :  { %4331 = vtanh.f32 %v402_v46 }
 0x106   :  { %v4314_v47 = vpop.eup %4313 }
 0x107   :  { %v4316_v48 = vpop.eup %4315  ;;  %v458_v49 = vmul.f32 0.5, %v4314_v47  ;;  %v3691_v50 = vpop.f32.mrb[10].mxu0 }
 0x108   :  { %v4318_v51 = vpop.eup %4317  ;;  %v457_v52 = vmul.f32 0.5, %v4316_v48  ;;  %4333 = vtanh.f32 %v3691_v50  ;;  %v412_v53 = vpop.f32.mrb[11].mxu0 }
 0x109   :  { %v4320_v54 = vpop.eup %4319  ;;  %v470_v55 = vadd.f32 0.5, %v458_v49  ;;  %4335 = vtanh.f32 %v412_v53 }
 0x10a   :  { %v4322_v56 = vpop.eup %4321  ;;  %v469_v57 = vadd.f32 0.5, %v457_v52 }
 0x10b   :  { %v4324_v58 = vpop.eup %4323  ;;  %v482_v59 = vmul.f32 %v4318_v51, %v470_v55  ;;  %v460_v60 = vmul.f32 0.5, %v4322_v56  ;;  %v3694_v61 = vpop.f32.mrb[12].mxu0 }
 0x10c   :  { %v4326_v62 = vpop.eup %4325  ;;  %v481_v63 = vmul.f32 %v4320_v54, %v469_v57  ;;  %v459_v0 = vmul.f32 0.5, %v4324_v58  ;;  %v422_v4 = vpop.f32.mrb[13].mxu0  ;;  %4337 = vtanh.f32 %v3694_v61 }
 0x10d   :  { %v4328_v34 = vpop.eup %4327  ;;  %v472_v37 = vadd.f32 0.5, %v460_v60  ;;  %4339 = vtanh.f32 %v422_v4 }
 0x10e   :  { %v4330_v38 = vpop.eup %4329  ;;  %v471_v39 = vadd.f32 0.5, %v459_v0 }
 0x10f   :  { %v4332_v40 = vpop.eup %4331  ;;  %v484_v41 = vmul.f32 %v4326_v62, %v472_v37  ;;  %v462_v42 = vmul.f32 0.5, %v4330_v38  ;;  %v3697_v43 = vpop.f32.mrb[14].mxu0 }
 0x110   :  { %v483_v44 = vmul.f32 %v4328_v34, %v471_v39  ;;  %v461_v45 = vmul.f32 0.5, %v4332_v40  ;;  %v438_v46 = vadd.f32 %v3697_v43, %v3671_v35  ;;  %v432_v47 = vpop.f32.mrb[15].mxu0 }
 0x111   :  { %v474_v48 = vadd.f32 0.5, %v462_v42  ;;  %v433_v49 = vadd.f32 %v432_v47, %v238_v36 }
 0x112   :  { %v4334_v50 = vpop.eup %4333  ;;  %v473_v51 = vadd.f32 0.5, %v461_v45  ;;  %4341 = vtanh.f32 %v438_v46 }
 0x113   :  { %v4336_v52 = vpop.eup %4335  ;;  %v486_v53 = vmul.f32 0.0, %v474_v48  ;;  %v464_v54 = vmul.f32 0.5, %v4334_v50  ;;  %4343 = vtanh.f32 %v433_v49 }
 0x114   :  { %v485_v55 = vmul.f32 0.0, %v473_v51  ;;  %v463_v56 = vmul.f32 0.5, %v4336_v52 }
 0x115   :  { %v4962_v57 = vadd.f32 %v486_v53, %v482_v59  ;;  %v476_v58 = vadd.f32 0.5, %v464_v54 }
 0x116   :  { %v4964_v60 = vadd.f32 %v485_v55, %v481_v63  ;;  %v475_v61 = vadd.f32 0.5, %v463_v56  ;;  %v4338_v62 = vpop.eup %4337  ;;  %v3143_v55 = vld [vmem:[%s5704_s0 + $0x10] sm:$0xff] }
 0x117   :  { %4345 = vtanh.f32 %v4962_v57  ;;  %v488_v35 = vmul.f32 0.0, %v476_v58  ;;  %v4340_v4 = vpop.eup %4339  ;;  %v466_v63 = vmul.f32 0.5, %v4338_v62  ;;  %3756 = vmatprep.subr.mxu0 %v3143_v55 }
 0x118   :  { %4347 = vtanh.f32 %v4964_v60  ;;  %v487_v36 = vmul.f32 0.0, %v475_v61  ;;  %v465_v38 = vmul.f32 0.5, %v4340_v4  ;;  %3757 = vmatpush3.msra.mxu0 %v3143_v55 }
 0x119   :  { %v4968_v0 = vadd.f32 %v488_v35, %v484_v41  ;;  %v478_v42 = vadd.f32 0.5, %v466_v63  ;;  %3759 = vmatmul.mubr.msk.f32.vlgmr.msra.gmra.mrb[16].mxu0 %vm53_vm0, %v4707_v2 }
 0x11a   :  { %v4970_v34 = vadd.f32 %v487_v36, %v483_v44  ;;  %v477_v45 = vadd.f32 0.5, %v465_v38  ;;  %3761 = vmatprep.mubr.msk.f32.mxu0 %vm53_vm0, %v4714_v3 }
 0x11b   :  { %4349 = vtanh.f32 %v4968_v0 }
 0x11c   :  { %v4342_v59 = vpop.eup %4341  ;;  %4351 = vtanh.f32 %v4970_v34 }
 0x11d   :  { %v4344_v37 = vpop.eup %4343  ;;  %v468_v39 = vmul.f32 0.5, %v4342_v59  ;;  %3762 = vmatmul.mubr.msk.f32.gmra.mrb[18].mxu0 %vm53_vm0, %v4723_v5 }
 0x11e   :  { %v467_v40 = vmul.f32 0.5, %v4344_v37  ;;  %3764 = vmatprep.mubr.msk.f32.mxu0 %vm53_vm0, %v4728_v6 }
 0x11f   :  { %v480_v41 = vadd.f32 0.5, %v468_v39 }
 0x120   :  { %v479_v49 = vadd.f32 0.5, %v467_v40 }
 0x121   :  { %v4346_v43 = vpop.eup %4345  ;;  %3765 = vmatmul.mubr.msk.f32.gmra.mrb[20].mxu0 %vm53_vm0, %v4737_v7 }
 0x122   :  { %v4348_v46 = vpop.eup %4347  ;;  %v498_v47 = vmul.f32 %v4346_v43, %v478_v42  ;;  %3767 = vmatprep.mubr.msk.f32.mxu0 %vm53_vm0, %v4742_v8 }
 0x123   :  { %v497_v48 = vmul.f32 %v4348_v46, %v477_v45 }
 0x125   :  { %v4350_v44 = vpop.eup %4349  ;;  %v4118_v50 = vpack.c.bf16 %v498_v47, %v497_v48  ;;  %3768 = vmatmul.mubr.msk.f32.gmra.mrb[22].mxu0 %vm53_vm0, %v4765_v11 }
 0x126   :  { %v4352_v51 = vpop.eup %4351  ;;  %v500_v52 = vmul.f32 %v4350_v44, %v480_v41  ;;  %3770 = vmatprep.mubr.msk.f32.mxu0 %vm53_vm0, %v4772_v12 }
 0x127   :  { %4119 = vmatprep.subr.bf16.mxu1 %v4118_v50  ;;  %v499_v53 = vmul.f32 %v4352_v51, %v479_v49 }
 0x128   :  { %4121 = vmatpush3.bf16.msra.mxu1 %v4118_v50 }
 0x129   :  { %v4122_v54 = vpack.c.bf16 %v500_v52, %v499_v53  ;;  %3771 = vmatmul.mubr.msk.f32.gmra.mrb[24].mxu0 %vm53_vm0, %v4781_v13 }
 0x12a   :  { %3773 = vmatprep.mubr.msk.f32.mxu0 %vm53_vm0, %v4786_v14 }
 0x12b   :  { %4123 = vmatprep.subr.bf16.mxu1 %v4122_v54 }
 0x12c   :  { %4125 = vmatpush3.bf16.msra.mxu1 %v4122_v54 }
 0x12d   :  { %3774 = vmatmul.mubr.msk.f32.gmra.mrb[26].mxu0 %vm53_vm0, %v4795_v15 }
 0x12e   :  { %3776 = vmatprep.mubr.msk.f32.mxu0 %vm53_vm0, %v4800_v16 }
 0x12f   :  { %3733 = vmatmul.mubr.msk.f32.vlgmr.msra.gmra.mrb[2].mxu1 %vm247_vm1, %v4823_v19 }
 0x130   :  { %3735 = vmatprep.mubr.msk.f32.mxu1 %vm247_vm1, %v4828_v20 }
 0x131   :  { %3777 = vmatmul.mubr.msk.f32.gmra.mrb[28].mxu0 %vm53_vm0, %v4809_v17 }
 0x132   :  { %3779 = vmatprep.mubr.msk.f32.mxu0 %vm53_vm0, %v4747_v9 }
 0x133   :  { %3736 = vmatmul.mubr.msk.f32.gmra.mrb[4].mxu1 %vm247_vm1, %v4837_v21 }
 0x134   :  { %3738 = vmatprep.mubr.msk.f32.mxu1 %vm247_vm1, %v4842_v22 }
 0x135   :  { %3780 = vmatmul.mubr.msk.f32.gmra.mrb[30].mxu0 %vm53_vm0, %v4754_v10 }
 0x136   :  { %3790 = vmatprep.mubr.msk.f32.mxu0 %vm247_vm1, %v4814_v18 }
 0x137   :  { %3739 = vmatmul.mubr.msk.f32.gmra.mrb[6].mxu1 %vm247_vm1, %v4851_v23 }
 0x138   :  { %3741 = vmatprep.mubr.msk.f32.mxu1 %vm247_vm1, %v4856_v24 }
 0x13b   :  { %3742 = vmatmul.mubr.msk.f32.gmra.mrb[8].mxu1 %vm247_vm1, %v4865_v25 }
 0x13c   :  { %3744 = vmatprep.mubr.msk.f32.mxu1 %vm247_vm1, %v4870_v26 }
 0x13f   :  { %3745 = vmatmul.mubr.msk.f32.gmra.mrb[10].mxu1 %vm247_vm1, %v4879_v27 }
 0x140   :  { %3747 = vmatprep.mubr.msk.f32.mxu1 %vm247_vm1, %v4884_v28 }
 0x143   :  { %3748 = vmatmul.mubr.msk.f32.gmra.mrb[12].mxu1 %vm247_vm1, %v4893_v29 }
 0x144   :  { %3750 = vmatprep.mubr.msk.f32.mxu1 %vm247_vm1, %v4898_v30 }
 0x147   :  { %3751 = vmatmul.mubr.msk.f32.gmra.mrb[14].mxu1 %vm247_vm1, %v4907_v31 }
 0x148   :  { %3753 = vmatprep.mubr.msk.f32.mxu1 %vm247_vm1, %v4912_v32 }
 0x14b   :  { %3754 = vmatmul.mubr.msk.f32.gmra.mrb[16].mxu1 %vm247_vm1, %v4921_v33 }
 0x14c   :  { %3816 = vmatprep.mubr.msk.f32.mxu1 %vm53_vm0, %v4702_v1 }
 0x202   :  { %v3734_v56 = vpop.f32.mrb[2].mxu1 }
 0x203   :  { %v714_v58 = vpop.f32.mrb[3].mxu1 }
 0x206   :  { %v3737_v61 = vpop.f32.mrb[4].mxu1 }
 0x207   :  { %v724_v35 = vpop.f32.mrb[5].mxu1 }
 0x20a   :  { %v3740_v36 = vpop.f32.mrb[6].mxu1 }
 0x20b   :  { %4353 = vtanh.f32 %v3740_v36  ;;  %v734_v62 = vpop.f32.mrb[7].mxu1 }
 0x20c   :  { %4355 = vtanh.f32 %v734_v62 }
 0x20d   :  { %4357 = vtanh.f32 %v3734_v56 }
 0x20e   :  { %4359 = vtanh.f32 %v714_v58  ;;  %v3743_v4 = vpop.f32.mrb[8].mxu1 }
 0x20f   :  { %4361 = vtanh.f32 %v3743_v4  ;;  %v744_v59 = vpop.f32.mrb[9].mxu1 }
 0x210   :  { %4363 = vtanh.f32 %v744_v59 }
 0x211   :  { %4365 = vtanh.f32 %v3737_v61 }
 0x212   :  { %4367 = vtanh.f32 %v724_v35  ;;  %v3746_v63 = vpop.f32.mrb[10].mxu1 }
 0x213   :  { %4369 = vtanh.f32 %v3746_v63  ;;  %v754_v37 = vpop.f32.mrb[11].mxu1 }
 0x214   :  { %4371 = vtanh.f32 %v754_v37 }
 0x215   :  { %v4354_v38 = vpop.eup %4353 }
 0x216   :  { %v4356_v39 = vpop.eup %4355  ;;  %v810_v40 = vmul.f32 0.5, %v4354_v38  ;;  %v3749_v42 = vpop.f32.mrb[12].mxu1 }
 0x217   :  { %v4358_v43 = vpop.eup %4357  ;;  %v809_v45 = vmul.f32 0.5, %v4356_v39  ;;  %4373 = vtanh.f32 %v3749_v42  ;;  %v764_v46 = vpop.f32.mrb[13].mxu1 }
 0x218   :  { %v4360_v47 = vpop.eup %4359  ;;  %v822_v41 = vadd.f32 0.5, %v810_v40  ;;  %4375 = vtanh.f32 %v764_v46 }
 0x219   :  { %v4362_v48 = vpop.eup %4361  ;;  %v821_v49 = vadd.f32 0.5, %v809_v45 }
 0x21a   :  { %v4364_v44 = vpop.eup %4363  ;;  %v834_v50 = vmul.f32 %v4358_v43, %v822_v41  ;;  %v812_v51 = vmul.f32 0.5, %v4362_v48  ;;  %v3752_v52 = vpop.f32.mrb[14].mxu1 }
 0x21b   :  { %v4366_v53 = vpop.eup %4365  ;;  %v833_v54 = vmul.f32 %v4360_v47, %v821_v49  ;;  %v811_v55 = vmul.f32 0.5, %v4364_v44  ;;  %v774_v56 = vpop.f32.mrb[15].mxu1  ;;  %4377 = vtanh.f32 %v3752_v52 }
 0x21c   :  { %v4368_v58 = vpop.eup %4367  ;;  %v824_v61 = vadd.f32 0.5, %v812_v51  ;;  %4379 = vtanh.f32 %v774_v56 }
 0x21d   :  { %v4370_v35 = vpop.eup %4369  ;;  %v823_v36 = vadd.f32 0.5, %v811_v55 }
 0x21e   :  { %v4372_v62 = vpop.eup %4371  ;;  %v836_v4 = vmul.f32 %v4366_v53, %v824_v61  ;;  %v814_v59 = vmul.f32 0.5, %v4370_v35  ;;  %v3755_v63 = vpop.f32.mrb[16].mxu1 }
 0x21f   :  { %v835_v37 = vmul.f32 %v4368_v58, %v823_v36  ;;  %v813_v38 = vmul.f32 0.5, %v4372_v62  ;;  %v784_v39 = vpop.f32.mrb[17].mxu1  ;;  %4381 = vtanh.f32 %v3755_v63 }
 0x220   :  { %v826_v40 = vadd.f32 0.5, %v814_v59  ;;  %4383 = vtanh.f32 %v784_v39 }
 0x221   :  { %v4374_v42 = vpop.eup %4373  ;;  %v825_v43 = vadd.f32 0.5, %v813_v38 }
 0x222   :  { %v4376_v45 = vpop.eup %4375  ;;  %v838_v46 = vmul.f32 %v826_v40, %v4962_v57  ;;  %v816_v47 = vmul.f32 0.5, %v4374_v42 }
 0x223   :  { %v837_v41 = vmul.f32 %v825_v43, %v4964_v60  ;;  %v815_v48 = vmul.f32 0.5, %v4376_v45 }
 0x224   :  { %v5043_v49 = vadd.f32 %v838_v46, %v834_v50  ;;  %v828_v44 = vadd.f32 0.5, %v816_v47 }
 0x225   :  { %v5045_v51 = vadd.f32 %v837_v41, %v833_v54  ;;  %v827_v52 = vadd.f32 0.5, %v815_v48  ;;  %v4378_v55 = vpop.eup %4377  ;;  %v3176_v41 = vld [vmem:[%s5704_s0 + $0x18] sm:$0xff] }
 0x226   :  { %4385 = vtanh.f32 %v5043_v49  ;;  %v840_v53 = vmul.f32 %v828_v44, %v4968_v0  ;;  %v4380_v60 = vpop.eup %4379  ;;  %v818_v50 = vmul.f32 0.5, %v4378_v55  ;;  %3814 = vmatprep.subr.mxu1 %v3176_v41 }
 0x227   :  { %4387 = vtanh.f32 %v5045_v51  ;;  %v839_v57 = vmul.f32 %v827_v52, %v4970_v34  ;;  %v817_v61 = vmul.f32 0.5, %v4380_v60  ;;  %3815 = vmatpush3.msra.mxu1 %v3176_v41 }
 0x228   :  { %v5051_v56 = vadd.f32 %v840_v53, %v836_v4  ;;  %v830_v36 = vadd.f32 0.5, %v818_v50  ;;  %3817 = vmatmul.mubr.msk.f32.vlgmr.msra.gmra.mrb[18].mxu1 %vm53_vm0, %v4707_v2 }
 0x229   :  { %v5053_v58 = vadd.f32 %v839_v57, %v835_v37  ;;  %v4382_v54 = vpop.eup %4381  ;;  %v829_v59 = vadd.f32 0.5, %v817_v61  ;;  %3819 = vmatprep.mubr.msk.f32.mxu1 %vm53_vm0, %v4714_v3 }
 0x22a   :  { %4389 = vtanh.f32 %v5051_v56  ;;  %v4384_v35 = vpop.eup %4383  ;;  %v820_v0 = vmul.f32 0.5, %v4382_v54 }
 0x22b   :  { %4391 = vtanh.f32 %v5053_v58  ;;  %v819_v63 = vmul.f32 0.5, %v4384_v35 }
 0x22c   :  { %v832_v39 = vadd.f32 0.5, %v820_v0  ;;  %3820 = vmatmul.mubr.msk.f32.gmra.mrb[20].mxu1 %vm53_vm0, %v4723_v5 }
 0x22d   :  { %v831_v37 = vadd.f32 0.5, %v819_v63  ;;  %3822 = vmatprep.mubr.msk.f32.mxu1 %vm53_vm0, %v4728_v6 }
 0x230   :  { %v4386_v62 = vpop.eup %4385  ;;  %3823 = vmatmul.mubr.msk.f32.gmra.mrb[22].mxu1 %vm53_vm0, %v4737_v7 }
 0x231   :  { %v4388_v34 = vpop.eup %4387  ;;  %v850_v38 = vmul.f32 %v4386_v62, %v830_v36  ;;  %3825 = vmatprep.mubr.msk.f32.mxu1 %vm53_vm0, %v4742_v8 }
 0x232   :  { %v849_v4 = vmul.f32 %v4388_v34, %v829_v59 }
 0x234   :  { %v4390_v40 = vpop.eup %4389  ;;  %v4126_v42 = vpack.c.bf16 %v850_v38, %v849_v4  ;;  %3826 = vmatmul.mubr.msk.f32.gmra.mrb[24].mxu1 %vm53_vm0, %v4765_v11 }
 0x235   :  { %v4392_v43 = vpop.eup %4391  ;;  %v852_v45 = vmul.f32 %v4390_v40, %v832_v39  ;;  %3828 = vmatprep.mubr.msk.f32.mxu1 %vm53_vm0, %v4772_v12 }
 0x236   :  { %v851_v46 = vmul.f32 %v4392_v43, %v831_v37  ;;  %4127 = vmatprep.subr.bf16.mxu0 %v4126_v42 }
 0x237   :  { %4129 = vmatpush3.bf16.msra.mxu0 %v4126_v42 }
 0x238   :  { %v4130_v47 = vpack.c.bf16 %v852_v45, %v851_v46  ;;  %3829 = vmatmul.mubr.msk.f32.gmra.mrb[26].mxu1 %vm53_vm0, %v4781_v13 }
 0x239   :  { %3831 = vmatprep.mubr.msk.f32.mxu1 %vm53_vm0, %v4786_v14 }
 0x23a   :  { %4131 = vmatprep.subr.bf16.mxu0 %v4130_v47 }
 0x23b   :  { %4133 = vmatpush3.bf16.msra.mxu0 %v4130_v47 }
 0x23c   :  { %3832 = vmatmul.mubr.msk.f32.gmra.mrb[28].mxu1 %vm53_vm0, %v4795_v15 }
 0x23d   :  { %3834 = vmatprep.mubr.msk.f32.mxu1 %vm53_vm0, %v4800_v16 }
 0x23e   :  { %3791 = vmatmul.mubr.msk.f32.vlgmr.msra.gmra.mrb[16].mxu0 %vm247_vm1, %v4823_v19 }
 0x23f   :  { %3793 = vmatprep.mubr.msk.f32.mxu0 %vm247_vm1, %v4828_v20 }
 0x240   :  { %3835 = vmatmul.mubr.msk.f32.gmra.mrb[30].mxu1 %vm53_vm0, %v4809_v17 }
 0x241   :  { %3837 = vmatprep.mubr.msk.f32.mxu1 %vm53_vm0, %v4747_v9 }
 0x242   :  { %3794 = vmatmul.mubr.msk.f32.gmra.mrb[18].mxu0 %vm247_vm1, %v4837_v21 }
 0x243   :  { %3796 = vmatprep.mubr.msk.f32.mxu0 %vm247_vm1, %v4842_v22 }
 0x244   :  { %3838 = vmatmul.mubr.msk.f32.gmra.mrb[32].mxu1 %vm53_vm0, %v4754_v10 }
 0x245   :  { %3848 = vmatprep.mubr.msk.f32.mxu1 %vm247_vm1, %v4814_v18 }
 0x246   :  { %3797 = vmatmul.mubr.msk.f32.gmra.mrb[20].mxu0 %vm247_vm1, %v4851_v23 }
 0x247   :  { %3799 = vmatprep.mubr.msk.f32.mxu0 %vm247_vm1, %v4856_v24 }
 0x24a   :  { %3800 = vmatmul.mubr.msk.f32.gmra.mrb[22].mxu0 %vm247_vm1, %v4865_v25 }
 0x24b   :  { %3802 = vmatprep.mubr.msk.f32.mxu0 %vm247_vm1, %v4870_v26 }
 0x24e   :  { %3803 = vmatmul.mubr.msk.f32.gmra.mrb[24].mxu0 %vm247_vm1, %v4879_v27 }
 0x24f   :  { %3805 = vmatprep.mubr.msk.f32.mxu0 %vm247_vm1, %v4884_v28 }
 0x252   :  { %3806 = vmatmul.mubr.msk.f32.gmra.mrb[26].mxu0 %vm247_vm1, %v4893_v29 }
 0x253   :  { %3808 = vmatprep.mubr.msk.f32.mxu0 %vm247_vm1, %v4898_v30 }
 0x256   :  { %3809 = vmatmul.mubr.msk.f32.gmra.mrb[28].mxu0 %vm247_vm1, %v4907_v31 }
 0x257   :  { %3811 = vmatprep.mubr.msk.f32.mxu0 %vm247_vm1, %v4912_v32 }
 0x25a   :  { %3812 = vmatmul.mubr.msk.f32.gmra.mrb[30].mxu0 %vm247_vm1, %v4921_v33 }
 0x25b   :  { %3874 = vmatprep.mubr.msk.f32.mxu0 %vm53_vm0, %v4702_v1 }
 0x311   :  { %v3792_v48 = vpop.f32.mrb[16].mxu0 }
 0x312   :  { %v1066_v44 = vpop.f32.mrb[17].mxu0 }
 0x315   :  { %v3795_v52 = vpop.f32.mrb[18].mxu0 }
 0x316   :  { %v1076_v53 = vpop.f32.mrb[19].mxu0 }
 0x319   :  { %v3798_v57 = vpop.f32.mrb[20].mxu0 }
 0x31a   :  { %4393 = vtanh.f32 %v3798_v57  ;;  %v1086_v55 = vpop.f32.mrb[21].mxu0 }
 0x31b   :  { %4395 = vtanh.f32 %v1086_v55 }
 0x31c   :  { %4397 = vtanh.f32 %v3792_v48 }
 0x31d   :  { %4399 = vtanh.f32 %v1066_v44  ;;  %v3801_v60 = vpop.f32.mrb[22].mxu0 }
 0x31e   :  { %4401 = vtanh.f32 %v3801_v60  ;;  %v1096_v50 = vpop.f32.mrb[23].mxu0 }
 0x31f   :  { %4403 = vtanh.f32 %v1096_v50 }
 0x320   :  { %4405 = vtanh.f32 %v3795_v52 }
 0x321   :  { %4407 = vtanh.f32 %v1076_v53  ;;  %v3804_v54 = vpop.f32.mrb[24].mxu0 }
 0x322   :  { %4409 = vtanh.f32 %v3804_v54  ;;  %v1106_v61 = vpop.f32.mrb[25].mxu0 }
 0x323   :  { %4411 = vtanh.f32 %v1106_v61 }
 0x324   :  { %v4394_v35 = vpop.eup %4393 }
 0x325   :  { %v4396_v36 = vpop.eup %4395  ;;  %v1162_v0 = vmul.f32 0.5, %v4394_v35  ;;  %v3807_v62 = vpop.f32.mrb[26].mxu0 }
 0x326   :  { %v4398_v59 = vpop.eup %4397  ;;  %v1161_v63 = vmul.f32 0.5, %v4396_v36  ;;  %4413 = vtanh.f32 %v3807_v62  ;;  %v1116_v34 = vpop.f32.mrb[27].mxu0 }
 0x327   :  { %v4400_v38 = vpop.eup %4399  ;;  %v1174_v4 = vadd.f32 0.5, %v1162_v0  ;;  %4415 = vtanh.f32 %v1116_v34 }
 0x328   :  { %v4402_v39 = vpop.eup %4401  ;;  %v1173_v40 = vadd.f32 0.5, %v1161_v63 }
 0x329   :  { %v4404_v37 = vpop.eup %4403  ;;  %v1186_v42 = vmul.f32 %v4398_v59, %v1174_v4  ;;  %v1164_v43 = vmul.f32 0.5, %v4402_v39  ;;  %v3810_v45 = vpop.f32.mrb[28].mxu0 }
 0x32a   :  { %v4406_v46 = vpop.eup %4405  ;;  %v1185_v47 = vmul.f32 %v4400_v38, %v1173_v40  ;;  %v1163_v41 = vmul.f32 0.5, %v4404_v37  ;;  %v1126_v48 = vpop.f32.mrb[29].mxu0  ;;  %4417 = vtanh.f32 %v3810_v45 }
 0x32b   :  { %v4408_v44 = vpop.eup %4407  ;;  %v1176_v52 = vadd.f32 0.5, %v1164_v43  ;;  %4419 = vtanh.f32 %v1126_v48 }
 0x32c   :  { %v4410_v53 = vpop.eup %4409  ;;  %v1175_v57 = vadd.f32 0.5, %v1163_v41 }
 0x32d   :  { %v4412_v55 = vpop.eup %4411  ;;  %v1188_v60 = vmul.f32 %v4406_v46, %v1176_v52  ;;  %v1166_v50 = vmul.f32 0.5, %v4410_v53  ;;  %v3813_v54 = vpop.f32.mrb[30].mxu0 }
 0x32e   :  { %v1187_v61 = vmul.f32 %v4408_v44, %v1175_v57  ;;  %v1165_v35 = vmul.f32 0.5, %v4412_v55  ;;  %v1136_v36 = vpop.f32.mrb[31].mxu0  ;;  %4421 = vtanh.f32 %v3813_v54 }
 0x32f   :  { %v1178_v0 = vadd.f32 0.5, %v1166_v50  ;;  %4423 = vtanh.f32 %v1136_v36 }
 0x330   :  { %v4414_v62 = vpop.eup %4413  ;;  %v1177_v59 = vadd.f32 0.5, %v1165_v35 }
 0x331   :  { %v4416_v63 = vpop.eup %4415  ;;  %v1190_v34 = vmul.f32 %v1178_v0, %v5043_v49  ;;  %v1168_v38 = vmul.f32 0.5, %v4414_v62 }
 0x332   :  { %v1189_v4 = vmul.f32 %v1177_v59, %v5045_v51  ;;  %v1167_v39 = vmul.f32 0.5, %v4416_v63 }
 0x333   :  { %v5126_v40 = vadd.f32 %v1190_v34, %v1186_v42  ;;  %v1180_v37 = vadd.f32 0.5, %v1168_v38 }
 0x334   :  { %v5128_v43 = vadd.f32 %v1189_v4, %v1185_v47  ;;  %v1179_v45 = vadd.f32 0.5, %v1167_v39  ;;  %v4418_v41 = vpop.eup %4417 }
 0x335   :  { %4425 = vtanh.f32 %v5126_v40  ;;  %v1192_v46 = vmul.f32 %v1180_v37, %v5051_v56  ;;  %v4420_v51 = vpop.eup %4419  ;;  %v1170_v42 = vmul.f32 0.5, %v4418_v41 }
 0x336   :  { %4427 = vtanh.f32 %v5128_v43  ;;  %v1191_v49 = vmul.f32 %v1179_v45, %v5053_v58  ;;  %v1169_v52 = vmul.f32 0.5, %v4420_v51 }
 0x337   :  { %v5134_v48 = vadd.f32 %v1192_v46, %v1188_v60  ;;  %v1182_v57 = vadd.f32 0.5, %v1170_v42 }
 0x338   :  { %v5136_v44 = vadd.f32 %v1191_v49, %v1187_v61  ;;  %v4422_v47 = vpop.eup %4421  ;;  %v1181_v50 = vadd.f32 0.5, %v1169_v52 }
 0x339   :  { %4429 = vtanh.f32 %v5134_v48  ;;  %v4424_v53 = vpop.eup %4423  ;;  %v1172_v56 = vmul.f32 0.5, %v4422_v47 }
 0x33a   :  { %4431 = vtanh.f32 %v5136_v44  ;;  %v1171_v54 = vmul.f32 0.5, %v4424_v53 }
 0x33b   :  { %v1184_v36 = vadd.f32 0.5, %v1172_v56 }
 0x33c   :  { %v1183_v61 = vadd.f32 0.5, %v1171_v54 }
 0x33f   :  { %v4426_v55 = vpop.eup %4425 }
 0x340   :  { %v4428_v58 = vpop.eup %4427  ;;  %v1202_v35 = vmul.f32 %v4426_v55, %v1182_v57 }
 0x341   :  { %v1201_v60 = vmul.f32 %v4428_v58, %v1181_v50 }
 0x343   :  { %v4430_v0 = vpop.eup %4429  ;;  %v4134_v62 = vpack.c.bf16 %v1202_v35, %v1201_v60 }
 0x344   :  { %v4432_v59 = vpop.eup %4431  ;;  %v1204_v63 = vmul.f32 %v4430_v0, %v1184_v36 }
 0x345   :  { %v1203_v34 = vmul.f32 %v4432_v59, %v1183_v61  ;;  %4135 = vmatprep.subr.bf16.mxu1 %v4134_v62 }
 0x346   :  { %4137 = vmatpush3.bf16.msra.mxu1 %v4134_v62 }
 0x347   :  { %v4138_v38 = vpack.c.bf16 %v1204_v63, %v1203_v34 }
 0x349   :  { %4139 = vmatprep.subr.bf16.mxu1 %v4138_v38 }
 0x34a   :  { %4141 = vmatpush3.bf16.msra.mxu1 %v4138_v38 }
 0x34d   :  { %3849 = vmatmul.mubr.msk.f32.vlgmr.msra.gmra.mrb[18].mxu1 %vm247_vm1, %v4823_v19  ;;  %v3209_v19 = vld [vmem:[%s5704_s0 + $0x20] sm:$0xff] }
 0x34e   :  { %3851 = vmatprep.mubr.msk.f32.mxu1 %vm247_vm1, %v4828_v20  ;;  %3872 = vmatprep.subr.mxu0 %v3209_v19 }
 0x34f   :  { %3873 = vmatpush3.msra.mxu0 %v3209_v19 }
 0x350   :  { %3875 = vmatmul.mubr.msk.f32.vlgmr.msra.gmra.mrb[32].mxu0 %vm53_vm0, %v4707_v2 }
 0x351   :  { %3852 = vmatmul.mubr.msk.f32.gmra.mrb[20].mxu1 %vm247_vm1, %v4837_v21  ;;  %3877 = vmatprep.mubr.msk.f32.mxu0 %vm53_vm0, %v4714_v3 }
 0x352   :  { %3854 = vmatprep.mubr.msk.f32.mxu1 %vm247_vm1, %v4842_v22 }
 0x354   :  { %3878 = vmatmul.mubr.msk.f32.gmra.mrb[34].mxu0 %vm53_vm0, %v4723_v5 }
 0x355   :  { %3855 = vmatmul.mubr.msk.f32.gmra.mrb[22].mxu1 %vm247_vm1, %v4851_v23  ;;  %3880 = vmatprep.mubr.msk.f32.mxu0 %vm53_vm0, %v4728_v6 }
 0x356   :  { %3857 = vmatprep.mubr.msk.f32.mxu1 %vm247_vm1, %v4856_v24 }
 0x358   :  { %3881 = vmatmul.mubr.msk.f32.gmra.mrb[36].mxu0 %vm53_vm0, %v4737_v7 }
 0x359   :  { %3858 = vmatmul.mubr.msk.f32.gmra.mrb[24].mxu1 %vm247_vm1, %v4865_v25  ;;  %3883 = vmatprep.mubr.msk.f32.mxu0 %vm53_vm0, %v4742_v8 }
 0x35a   :  { %3860 = vmatprep.mubr.msk.f32.mxu1 %vm247_vm1, %v4870_v26 }
 0x35c   :  { %3884 = vmatmul.mubr.msk.f32.gmra.mrb[38].mxu0 %vm53_vm0, %v4765_v11 }
 0x35d   :  { %3861 = vmatmul.mubr.msk.f32.gmra.mrb[26].mxu1 %vm247_vm1, %v4879_v27  ;;  %3886 = vmatprep.mubr.msk.f32.mxu0 %vm53_vm0, %v4772_v12 }
 0x35e   :  { %3863 = vmatprep.mubr.msk.f32.mxu1 %vm247_vm1, %v4884_v28 }
 0x360   :  { %3887 = vmatmul.mubr.msk.f32.gmra.mrb[40].mxu0 %vm53_vm0, %v4781_v13 }
 0x361   :  { %3864 = vmatmul.mubr.msk.f32.gmra.mrb[28].mxu1 %vm247_vm1, %v4893_v29  ;;  %3889 = vmatprep.mubr.msk.f32.mxu0 %vm53_vm0, %v4786_v14 }
 0x362   :  { %3866 = vmatprep.mubr.msk.f32.mxu1 %vm247_vm1, %v4898_v30 }
 0x364   :  { %3890 = vmatmul.mubr.msk.f32.gmra.mrb[42].mxu0 %vm53_vm0, %v4795_v15 }
 0x365   :  { %3867 = vmatmul.mubr.msk.f32.gmra.mrb[30].mxu1 %vm247_vm1, %v4907_v31  ;;  %3892 = vmatprep.mubr.msk.f32.mxu0 %vm53_vm0, %v4800_v16 }
 0x366   :  { %3869 = vmatprep.mubr.msk.f32.mxu1 %vm247_vm1, %v4912_v32 }
 0x368   :  { %3893 = vmatmul.mubr.msk.f32.gmra.mrb[44].mxu0 %vm53_vm0, %v4809_v17 }
 0x369   :  { %3870 = vmatmul.mubr.msk.f32.gmra.mrb[32].mxu1 %vm247_vm1, %v4921_v33  ;;  %3895 = vmatprep.mubr.msk.f32.mxu0 %vm53_vm0, %v4747_v9 }
 0x36a   :  { %3932 = vmatprep.mubr.msk.f32.mxu1 %vm53_vm0, %v4702_v1 }
 0x36c   :  { %3896 = vmatmul.mubr.msk.f32.gmra.mrb[46].mxu0 %vm53_vm0, %v4754_v10 }
 0x36d   :  { %3906 = vmatprep.mubr.msk.f32.mxu0 %vm247_vm1, %v4814_v18 }
 0x420   :  { %v3850_v1 = vpop.f32.mrb[18].mxu1 }
 0x421   :  { %v1418_v2 = vpop.f32.mrb[19].mxu1 }
 0x424   :  { %v3853_v3 = vpop.f32.mrb[20].mxu1 }
 0x425   :  { %v1428_v5 = vpop.f32.mrb[21].mxu1 }
 0x428   :  { %v3856_v6 = vpop.f32.mrb[22].mxu1 }
 0x429   :  { %4433 = vtanh.f32 %v3856_v6  ;;  %v1438_v7 = vpop.f32.mrb[23].mxu1 }
 0x42a   :  { %4435 = vtanh.f32 %v1438_v7 }
 0x42b   :  { %4437 = vtanh.f32 %v3850_v1 }
 0x42c   :  { %4439 = vtanh.f32 %v1418_v2  ;;  %v3859_v8 = vpop.f32.mrb[24].mxu1 }
 0x42d   :  { %4441 = vtanh.f32 %v3859_v8  ;;  %v1448_v11 = vpop.f32.mrb[25].mxu1 }
 0x42e   :  { %4443 = vtanh.f32 %v1448_v11 }
 0x42f   :  { %4445 = vtanh.f32 %v3853_v3 }
 0x430   :  { %4447 = vtanh.f32 %v1428_v5  ;;  %v3862_v9 = vpop.f32.mrb[26].mxu1 }
 0x431   :  { %4449 = vtanh.f32 %v3862_v9  ;;  %v1458_v10 = vpop.f32.mrb[27].mxu1 }
 0x432   :  { %4451 = vtanh.f32 %v1458_v10 }
 0x433   :  { %v4434_v12 = vpop.eup %4433 }
 0x434   :  { %v4436_v13 = vpop.eup %4435  ;;  %v1514_v14 = vmul.f32 0.5, %v4434_v12  ;;  %v3865_v15 = vpop.f32.mrb[28].mxu1 }
 0x435   :  { %v4438_v16 = vpop.eup %4437  ;;  %v1513_v17 = vmul.f32 0.5, %v4436_v13  ;;  %4453 = vtanh.f32 %v3865_v15  ;;  %v1468_v18 = vpop.f32.mrb[29].mxu1 }
 0x436   :  { %v4440_v20 = vpop.eup %4439  ;;  %v1526_v21 = vadd.f32 0.5, %v1514_v14  ;;  %4455 = vtanh.f32 %v1468_v18  ;;  %v5240_v18 = vld [vmem:[%s5706_s1 + $0x18] sm:$0xff] }
 0x437   :  { %v4442_v22 = vpop.eup %4441  ;;  %v1525_v23 = vadd.f32 0.5, %v1513_v17  ;;  %v5233_v17 = vld [vmem:[%s5706_s1 + $0x10] sm:$0xff] }
 0x438   :  { %v4444_v24 = vpop.eup %4443  ;;  %v1538_v25 = vmul.f32 %v4438_v16, %v1526_v21  ;;  %v1516_v26 = vmul.f32 0.5, %v4442_v22  ;;  %v3868_v27 = vpop.f32.mrb[30].mxu1  ;;  %v5226_v16 = vld [vmem:[%s5706_s1 + $0x8] sm:$0xff]  ;;  %v5261_v22 = vld [vmem:[%s5706_s1 + $0x30] sm:$0xff] }
 0x439   :  { %v4446_v28 = vpop.eup %4445  ;;  %v1537_v29 = vmul.f32 %v4440_v20, %v1525_v23  ;;  %v1515_v30 = vmul.f32 0.5, %v4444_v24  ;;  %v1478_v31 = vpop.f32.mrb[31].mxu1  ;;  %4457 = vtanh.f32 %v3868_v27  ;;  %v5247_v20 = vld [vmem:[%s5706_s1 + $0x20] sm:$0xff]  ;;  %v5254_v21 = vld [vmem:[%s5706_s1 + $0x28] sm:$0xff]  ;;  %v5268_v23 = vld [vmem:[%s5706_s1 + $0x38] sm:$0xff] }
 0x43a   :  { %v4448_v32 = vpop.eup %4447  ;;  %v1528_v33 = vadd.f32 0.5, %v1516_v26  ;;  %4459 = vtanh.f32 %v1478_v31  ;;  %v5275_v24 = vld [vmem:[%s5706_s1 + $0x40] sm:$0xff]  ;;  %v5289_v26 = vld [vmem:[%s5706_s1 + $0x50] sm:$0xff]  ;;  %v5296_v27 = vld [vmem:[%s5706_s1 + $0x58] sm:$0xff] }
 0x43b   :  { %v4450_v4 = vpop.eup %4449  ;;  %v1527_v39 = vadd.f32 0.5, %v1515_v30  ;;  %v5317_v30 = vld [vmem:[%s5706_s1 + $0x70] sm:$0xff]  ;;  %v5324_v31 = vld [vmem:[%s5706_s1 + $0x78] sm:$0xff] }
 0x43c   :  { %v4452_v37 = vpop.eup %4451  ;;  %v1540_v45 = vmul.f32 %v4446_v28, %v1528_v33  ;;  %v1518_v46 = vmul.f32 0.5, %v4450_v4  ;;  %v3871_v49 = vpop.f32.mrb[32].mxu1  ;;  %v5303_v28 = vld [vmem:[%s5706_s1 + $0x60] sm:$0xff]  ;;  %v3242_v33 = vld [vmem:[%s5704_s0 + $0x28] sm:$0xff] }
 0x43d   :  { %v1539_v41 = vmul.f32 %v4448_v32, %v1527_v39  ;;  %v1517_v51 = vmul.f32 0.5, %v4452_v37  ;;  %v1488_v42 = vpop.f32.mrb[33].mxu1  ;;  %4461 = vtanh.f32 %v3871_v49  ;;  %v5331_v32 = vld [vmem:[%s5705_s2] sm:$0xff]  ;;  %3930 = vmatprep.subr.mxu1 %v3242_v33  ;;  %v5341_v4 = vld [vmem:[%s5705_s2 + $0x8] sm:$0xff]  ;;  %v5348_v39 = vld [vmem:[%s5705_s2 + $0x10] sm:$0xff] }
 0x43e   :  { %v1530_v47 = vadd.f32 0.5, %v1518_v46  ;;  %4463 = vtanh.f32 %v1488_v42  ;;  %3931 = vmatpush3.msra.mxu1 %v3242_v33  ;;  %v5355_v37 = vld [vmem:[%s5705_s2 + $0x18] sm:$0xff]  ;;  %v5369_v46 = vld [vmem:[%s5705_s2 + $0x28] sm:$0xff]  ;;  %v5376_v49 = vld [vmem:[%s5705_s2 + $0x30] sm:$0xff] }
 0x43f   :  { %v4454_v52 = vpop.eup %4453  ;;  %v1529_v53 = vadd.f32 0.5, %v1517_v51  ;;  %3933 = vmatmul.mubr.msk.f32.vlgmr.msra.gmra.mrb[34].mxu1 %vm53_vm0, %v5341_v4  ;;  %v5390_v51 = vld [vmem:[%s5705_s2 + $0x40] sm:$0xff]  ;;  %v5397_v42 = vld [vmem:[%s5705_s2 + $0x48] sm:$0xff] }
 0x440   :  { %v4456_v57 = vpop.eup %4455  ;;  %v1542_v56 = vmul.f32 %v1530_v47, %v5126_v40  ;;  %v1520_v55 = vmul.f32 0.5, %v4454_v52  ;;  %3935 = vmatprep.mubr.msk.f32.mxu1 %vm53_vm0, %v5348_v39  ;;  %v5404_v47 = vld [vmem:[%s5705_s2 + $0x50] sm:$0xff]  ;;  %v5411_v52 = vld [vmem:[%s5705_s2 + $0x58] sm:$0xff] }
 0x441   :  { %v1541_v50 = vmul.f32 %v1529_v53, %v5128_v43  ;;  %v1519_v54 = vmul.f32 0.5, %v4456_v57  ;;  %v5418_v53 = vld [vmem:[%s5705_s2 + $0x60] sm:$0xff]  ;;  %v5425_v57 = vld [vmem:[%s5705_s2 + $0x68] sm:$0xff] }
 0x442   :  { %v5209_v58 = vadd.f32 %v1542_v56, %v1538_v25  ;;  %v1532_v35 = vadd.f32 0.5, %v1520_v55  ;;  %v5282_v25 = vld [vmem:[%s5706_s1 + $0x48] sm:$0xff]  ;;  %v5432_v56 = vld [vmem:[%s5705_s2 + $0x70] sm:$0xff]  ;;  %v5439_v55 = vld [vmem:[%s5705_s2 + $0x78] sm:$0xff] }
 0x443   :  { %v5211_v60 = vadd.f32 %v1541_v50, %v1537_v29  ;;  %v1531_v36 = vadd.f32 0.5, %v1519_v54  ;;  %v4458_v61 = vpop.eup %4457  ;;  %v5310_v29 = vld [vmem:[%s5706_s1 + $0x68] sm:$0xff]  ;;  %3936 = vmatmul.mubr.msk.f32.gmra.mrb[36].mxu1 %vm53_vm0, %v5355_v37  ;;  %v5446_v50 = vld [vmem:[%s5706_s1] sm:$0xff] }
 0x444   :  { %4465 = vtanh.f32 %v5209_v58  ;;  %v1544_v0 = vmul.f32 %v1532_v35, %v5134_v48  ;;  %v4460_v43 = vpop.eup %4459  ;;  %v1522_v63 = vmul.f32 0.5, %v4458_v61 }
 0x445   :  { %4467 = vtanh.f32 %v5211_v60  ;;  %v1543_v40 = vmul.f32 %v1531_v36, %v5136_v44  ;;  %v1521_v38 = vmul.f32 0.5, %v4460_v43 }
 0x446   :  { %v5217_v62 = vadd.f32 %v1544_v0, %v1540_v45  ;;  %v1534_v1 = vadd.f32 0.5, %v1522_v63  ;;  %v5362_v45 = vld [vmem:[%s5705_s2 + $0x20] sm:$0xff] }
 0x447   :  { %v5219_v59 = vadd.f32 %v1543_v40, %v1539_v41  ;;  %v4462_v34 = vpop.eup %4461  ;;  %v1533_v3 = vadd.f32 0.5, %v1521_v38  ;;  %3938 = vmatprep.mubr.msk.f32.mxu1 %vm53_vm0, %v5362_v45  ;;  %v5383_v41 = vld [vmem:[%s5705_s2 + $0x38] sm:$0xff] }
 0x448   :  { %4469 = vtanh.f32 %v5217_v62  ;;  %v4464_v19 = vpop.eup %4463  ;;  %v1524_v48 = vmul.f32 0.5, %v4462_v34  ;;  %3939 = vmatmul.mubr.msk.f32.gmra.mrb[38].mxu1 %vm53_vm0, %v5369_v46 }
 0x449   :  { %4471 = vtanh.f32 %v5219_v59  ;;  %v1523_v5 = vmul.f32 0.5, %v4464_v19  ;;  %3941 = vmatprep.mubr.msk.f32.mxu1 %vm53_vm0, %v5376_v49 }
 0x44a   :  { %v1536_v8 = vadd.f32 0.5, %v1524_v48 }
 0x44b   :  { %v1535_v9 = vadd.f32 0.5, %v1523_v5 }
 0x44c   :  { %3942 = vmatmul.mubr.msk.f32.gmra.mrb[40].mxu1 %vm53_vm0, %v5383_v41 }
 0x44d   :  { %3944 = vmatprep.mubr.msk.f32.mxu1 %vm53_vm0, %v5390_v51 }
 0x44e   :  { %v4466_v2 = vpop.eup %4465 }
 0x44f   :  { %v4468_v44 = vpop.eup %4467  ;;  %v1554_v6 = vmul.f32 %v4466_v2, %v1534_v1 }
 0x450   :  { %v1553_v7 = vmul.f32 %v4468_v44, %v1533_v3  ;;  %3945 = vmatmul.mubr.msk.f32.gmra.mrb[42].mxu1 %vm53_vm0, %v5397_v42 }
 0x451   :  { %3947 = vmatprep.mubr.msk.f32.mxu1 %vm53_vm0, %v5404_v47 }
 0x452   :  { %v4470_v11 = vpop.eup %4469  ;;  %v4142_v10 = vpack.c.bf16 %v1554_v6, %v1553_v7 }
 0x453   :  { %v4472_v12 = vpop.eup %4471  ;;  %v1556_v13 = vmul.f32 %v4470_v11, %v1536_v8 }
 0x454   :  { %v1555_v14 = vmul.f32 %v4472_v12, %v1535_v9  ;;  %4143 = vmatprep.subr.bf16.mxu0 %v4142_v10  ;;  %3948 = vmatmul.mubr.msk.f32.gmra.mrb[44].mxu1 %vm53_vm0, %v5411_v52 }
 0x455   :  { %4145 = vmatpush3.bf16.msra.mxu0 %v4142_v10  ;;  %3950 = vmatprep.mubr.msk.f32.mxu1 %vm53_vm0, %v5418_v53 }
 0x456   :  { %v4146_v15 = vpack.c.bf16 %v1556_v13, %v1555_v14 }
 0x458   :  { %4147 = vmatprep.subr.bf16.mxu0 %v4146_v15  ;;  %3951 = vmatmul.mubr.msk.f32.gmra.mrb[46].mxu1 %vm53_vm0, %v5425_v57 }
 0x459   :  { %4149 = vmatpush3.bf16.msra.mxu0 %v4146_v15  ;;  %3953 = vmatprep.mubr.msk.f32.mxu1 %vm53_vm0, %v5432_v56 }
 0x45c   :  { %3907 = vmatmul.mubr.msk.f32.vlgmr.msra.gmra.mrb[32].mxu0 %vm247_vm1, %v5226_v16  ;;  %3954 = vmatmul.mubr.msk.f32.gmra.mrb[48].mxu1 %vm53_vm0, %v5439_v55 }
 0x45d   :  { %3909 = vmatprep.mubr.msk.f32.mxu0 %vm247_vm1, %v5233_v17  ;;  %3964 = vmatprep.mubr.msk.f32.mxu1 %vm247_vm1, %v5446_v50 }
 0x460   :  { %3910 = vmatmul.mubr.msk.f32.gmra.mrb[34].mxu0 %vm247_vm1, %v5240_v18 }
 0x461   :  { %3912 = vmatprep.mubr.msk.f32.mxu0 %vm247_vm1, %v5247_v20 }
 0x464   :  { %3913 = vmatmul.mubr.msk.f32.gmra.mrb[36].mxu0 %vm247_vm1, %v5254_v21 }
 0x465   :  { %3915 = vmatprep.mubr.msk.f32.mxu0 %vm247_vm1, %v5261_v22 }
 0x468   :  { %3916 = vmatmul.mubr.msk.f32.gmra.mrb[38].mxu0 %vm247_vm1, %v5268_v23 }
 0x469   :  { %3918 = vmatprep.mubr.msk.f32.mxu0 %vm247_vm1, %v5275_v24 }
 0x46c   :  { %3919 = vmatmul.mubr.msk.f32.gmra.mrb[40].mxu0 %vm247_vm1, %v5282_v25 }
 0x46d   :  { %3921 = vmatprep.mubr.msk.f32.mxu0 %vm247_vm1, %v5289_v26 }
 0x470   :  { %3922 = vmatmul.mubr.msk.f32.gmra.mrb[42].mxu0 %vm247_vm1, %v5296_v27 }
 0x471   :  { %3924 = vmatprep.mubr.msk.f32.mxu0 %vm247_vm1, %v5303_v28 }
 0x474   :  { %3925 = vmatmul.mubr.msk.f32.gmra.mrb[44].mxu0 %vm247_vm1, %v5310_v29 }
 0x475   :  { %3927 = vmatprep.mubr.msk.f32.mxu0 %vm247_vm1, %v5317_v30 }
 0x478   :  { %3928 = vmatmul.mubr.msk.f32.gmra.mrb[46].mxu0 %vm247_vm1, %v5324_v31 }
 0x479   :  { %3990 = vmatprep.mubr.msk.f32.mxu0 %vm53_vm0, %v5331_v32 }
 0x52f   :  { %v3908_v54 = vpop.f32.mrb[32].mxu0 }
 0x530   :  { %v1770_v35 = vpop.f32.mrb[33].mxu0 }
 0x533   :  { %v3911_v36 = vpop.f32.mrb[34].mxu0 }
 0x534   :  { %v1780_v0 = vpop.f32.mrb[35].mxu0 }
 0x537   :  { %v3914_v40 = vpop.f32.mrb[36].mxu0 }
 0x538   :  { %4473 = vtanh.f32 %v3914_v40  ;;  %v1790_v61 = vpop.f32.mrb[37].mxu0 }
 0x539   :  { %4475 = vtanh.f32 %v1790_v61 }
 0x53a   :  { %4477 = vtanh.f32 %v3908_v54 }
 0x53b   :  { %4479 = vtanh.f32 %v1770_v35  ;;  %v3917_v43 = vpop.f32.mrb[38].mxu0 }
 0x53c   :  { %4481 = vtanh.f32 %v3917_v43  ;;  %v1800_v63 = vpop.f32.mrb[39].mxu0 }
 0x53d   :  { %4483 = vtanh.f32 %v1800_v63 }
 0x53e   :  { %4485 = vtanh.f32 %v3911_v36 }
 0x53f   :  { %4487 = vtanh.f32 %v1780_v0  ;;  %v3920_v34 = vpop.f32.mrb[40].mxu0 }
 0x540   :  { %4489 = vtanh.f32 %v3920_v34  ;;  %v1810_v38 = vpop.f32.mrb[41].mxu0 }
 0x541   :  { %4491 = vtanh.f32 %v1810_v38 }
 0x542   :  { %v4474_v19 = vpop.eup %4473 }
 0x543   :  { %v4476_v1 = vpop.eup %4475  ;;  %v1866_v48 = vmul.f32 0.5, %v4474_v19  ;;  %v3923_v2 = vpop.f32.mrb[42].mxu0 }
 0x544   :  { %v4478_v3 = vpop.eup %4477  ;;  %v1865_v5 = vmul.f32 0.5, %v4476_v1  ;;  %4493 = vtanh.f32 %v3923_v2  ;;  %v1820_v44 = vpop.f32.mrb[43].mxu0 }
 0x545   :  { %v4480_v6 = vpop.eup %4479  ;;  %v1878_v7 = vadd.f32 0.5, %v1866_v48  ;;  %4495 = vtanh.f32 %v1820_v44 }
 0x546   :  { %v4482_v8 = vpop.eup %4481  ;;  %v1877_v11 = vadd.f32 0.5, %v1865_v5 }
 0x547   :  { %v4484_v9 = vpop.eup %4483  ;;  %v1890_v10 = vmul.f32 %v4478_v3, %v1878_v7  ;;  %v1868_v12 = vmul.f32 0.5, %v4482_v8  ;;  %v3926_v13 = vpop.f32.mrb[44].mxu0 }
 0x548   :  { %v4486_v14 = vpop.eup %4485  ;;  %v1889_v15 = vmul.f32 %v4480_v6, %v1877_v11  ;;  %v1867_v33 = vmul.f32 0.5, %v4484_v9  ;;  %v1830_v54 = vpop.f32.mrb[45].mxu0  ;;  %4497 = vtanh.f32 %v3926_v13 }
 0x549   :  { %v4488_v35 = vpop.eup %4487  ;;  %v1880_v36 = vadd.f32 0.5, %v1868_v12  ;;  %4499 = vtanh.f32 %v1830_v54 }
 0x54a   :  { %v4490_v0 = vpop.eup %4489  ;;  %v1879_v40 = vadd.f32 0.5, %v1867_v33 }
 0x54b   :  { %v4492_v61 = vpop.eup %4491  ;;  %v1892_v43 = vmul.f32 %v4486_v14, %v1880_v36  ;;  %v1870_v63 = vmul.f32 0.5, %v4490_v0  ;;  %v3929_v34 = vpop.f32.mrb[46].mxu0 }
 0x54c   :  { %v1891_v38 = vmul.f32 %v4488_v35, %v1879_v40  ;;  %v1869_v19 = vmul.f32 0.5, %v4492_v61  ;;  %v1840_v1 = vpop.f32.mrb[47].mxu0  ;;  %4501 = vtanh.f32 %v3929_v34 }
 0x54d   :  { %v1882_v48 = vadd.f32 0.5, %v1870_v63  ;;  %4503 = vtanh.f32 %v1840_v1 }
 0x54e   :  { %v4494_v2 = vpop.eup %4493  ;;  %v1881_v3 = vadd.f32 0.5, %v1869_v19 }
 0x54f   :  { %v4496_v5 = vpop.eup %4495  ;;  %v1894_v44 = vmul.f32 %v1882_v48, %v5209_v58  ;;  %v1872_v6 = vmul.f32 0.5, %v4494_v2 }
 0x550   :  { %v1893_v7 = vmul.f32 %v1881_v3, %v5211_v60  ;;  %v1871_v8 = vmul.f32 0.5, %v4496_v5 }
 0x551   :  { %v5452_v11 = vadd.f32 %v1894_v44, %v1890_v10  ;;  %v1884_v9 = vadd.f32 0.5, %v1872_v6 }
 0x552   :  { %v5454_v12 = vadd.f32 %v1893_v7, %v1889_v15  ;;  %v1883_v13 = vadd.f32 0.5, %v1871_v8  ;;  %v4498_v33 = vpop.eup %4497  ;;  %v3275_v7 = vld [vmem:[%s5704_s0 + $0x30] sm:$0xff] }
 0x553   :  { %4505 = vtanh.f32 %v5452_v11  ;;  %v1896_v14 = vmul.f32 %v1884_v9, %v5217_v62  ;;  %v4500_v60 = vpop.eup %4499  ;;  %v1874_v10 = vmul.f32 0.5, %v4498_v33  ;;  %3988 = vmatprep.subr.mxu0 %v3275_v7 }
 0x554   :  { %4507 = vtanh.f32 %v5454_v12  ;;  %v1895_v58 = vmul.f32 %v1883_v13, %v5219_v59  ;;  %v1873_v36 = vmul.f32 0.5, %v4500_v60  ;;  %3989 = vmatpush3.msra.mxu0 %v3275_v7 }
 0x555   :  { %v5460_v54 = vadd.f32 %v1896_v14, %v1892_v43  ;;  %v1886_v40 = vadd.f32 0.5, %v1874_v10  ;;  %3991 = vmatmul.mubr.msk.f32.vlgmr.msra.gmra.mrb[48].mxu0 %vm53_vm0, %v5341_v4 }
 0x556   :  { %v5462_v35 = vadd.f32 %v1895_v58, %v1891_v38  ;;  %v4502_v15 = vpop.eup %4501  ;;  %v1885_v63 = vadd.f32 0.5, %v1873_v36  ;;  %3993 = vmatprep.mubr.msk.f32.mxu0 %vm53_vm0, %v5348_v39 }
 0x557   :  { %4509 = vtanh.f32 %v5460_v54  ;;  %v4504_v0 = vpop.eup %4503  ;;  %v1876_v62 = vmul.f32 0.5, %v4502_v15 }
 0x558   :  { %4511 = vtanh.f32 %v5462_v35  ;;  %v1875_v34 = vmul.f32 0.5, %v4504_v0 }
 0x559   :  { %v1888_v1 = vadd.f32 0.5, %v1876_v62  ;;  %3994 = vmatmul.mubr.msk.f32.gmra.mrb[50].mxu0 %vm53_vm0, %v5355_v37 }
 0x55a   :  { %v1887_v38 = vadd.f32 0.5, %v1875_v34  ;;  %3996 = vmatprep.mubr.msk.f32.mxu0 %vm53_vm0, %v5362_v45 }
 0x55d   :  { %v4506_v61 = vpop.eup %4505  ;;  %3997 = vmatmul.mubr.msk.f32.gmra.mrb[52].mxu0 %vm53_vm0, %v5369_v46 }
 0x55e   :  { %v4508_v59 = vpop.eup %4507  ;;  %v1906_v19 = vmul.f32 %v4506_v61, %v1886_v40  ;;  %3999 = vmatprep.mubr.msk.f32.mxu0 %vm53_vm0, %v5376_v49 }
 0x55f   :  { %v1905_v43 = vmul.f32 %v4508_v59, %v1885_v63 }
 0x561   :  { %v4510_v48 = vpop.eup %4509  ;;  %v4150_v2 = vpack.c.bf16 %v1906_v19, %v1905_v43  ;;  %4000 = vmatmul.mubr.msk.f32.gmra.mrb[54].mxu0 %vm53_vm0, %v5383_v41 }
 0x562   :  { %v4512_v3 = vpop.eup %4511  ;;  %v1908_v5 = vmul.f32 %v4510_v48, %v1888_v1  ;;  %4002 = vmatprep.mubr.msk.f32.mxu0 %vm53_vm0, %v5390_v51 }
 0x563   :  { %v1907_v44 = vmul.f32 %v4512_v3, %v1887_v38  ;;  %4151 = vmatprep.subr.bf16.mxu1 %v4150_v2 }
 0x564   :  { %4153 = vmatpush3.bf16.msra.mxu1 %v4150_v2 }
 0x565   :  { %v4154_v6 = vpack.c.bf16 %v1908_v5, %v1907_v44  ;;  %4003 = vmatmul.mubr.msk.f32.gmra.mrb[56].mxu0 %vm53_vm0, %v5397_v42 }
 0x566   :  { %4005 = vmatprep.mubr.msk.f32.mxu0 %vm53_vm0, %v5404_v47 }
 0x567   :  { %4155 = vmatprep.subr.bf16.mxu1 %v4154_v6 }
 0x568   :  { %4157 = vmatpush3.bf16.msra.mxu1 %v4154_v6 }
 0x569   :  { %4006 = vmatmul.mubr.msk.f32.gmra.mrb[58].mxu0 %vm53_vm0, %v5411_v52 }
 0x56a   :  { %4008 = vmatprep.mubr.msk.f32.mxu0 %vm53_vm0, %v5418_v53 }
 0x56b   :  { %3965 = vmatmul.mubr.msk.f32.vlgmr.msra.gmra.mrb[34].mxu1 %vm247_vm1, %v5226_v16 }
 0x56c   :  { %3967 = vmatprep.mubr.msk.f32.mxu1 %vm247_vm1, %v5233_v17 }
 0x56d   :  { %4009 = vmatmul.mubr.msk.f32.gmra.mrb[60].mxu0 %vm53_vm0, %v5425_v57 }
 0x56e   :  { %4011 = vmatprep.mubr.msk.f32.mxu0 %vm53_vm0, %v5432_v56 }
 0x56f   :  { %3968 = vmatmul.mubr.msk.f32.gmra.mrb[36].mxu1 %vm247_vm1, %v5240_v18 }
 0x570   :  { %3970 = vmatprep.mubr.msk.f32.mxu1 %vm247_vm1, %v5247_v20 }
 0x571   :  { %4012 = vmatmul.mubr.msk.f32.gmra.mrb[62].mxu0 %vm53_vm0, %v5439_v55 }
 0x572   :  { %4022 = vmatprep.mubr.msk.f32.mxu0 %vm247_vm1, %v5446_v50 }
 0x573   :  { %3971 = vmatmul.mubr.msk.f32.gmra.mrb[38].mxu1 %vm247_vm1, %v5254_v21 }
 0x574   :  { %3973 = vmatprep.mubr.msk.f32.mxu1 %vm247_vm1, %v5261_v22 }
 0x577   :  { %3974 = vmatmul.mubr.msk.f32.gmra.mrb[40].mxu1 %vm247_vm1, %v5268_v23 }
 0x578   :  { %3976 = vmatprep.mubr.msk.f32.mxu1 %vm247_vm1, %v5275_v24 }
 0x57b   :  { %3977 = vmatmul.mubr.msk.f32.gmra.mrb[42].mxu1 %vm247_vm1, %v5282_v25 }
 0x57c   :  { %3979 = vmatprep.mubr.msk.f32.mxu1 %vm247_vm1, %v5289_v26 }
 0x57f   :  { %3980 = vmatmul.mubr.msk.f32.gmra.mrb[44].mxu1 %vm247_vm1, %v5296_v27 }
 0x580   :  { %3982 = vmatprep.mubr.msk.f32.mxu1 %vm247_vm1, %v5303_v28 }
 0x583   :  { %3983 = vmatmul.mubr.msk.f32.gmra.mrb[46].mxu1 %vm247_vm1, %v5310_v29 }
 0x584   :  { %3985 = vmatprep.mubr.msk.f32.mxu1 %vm247_vm1, %v5317_v30 }
 0x587   :  { %3986 = vmatmul.mubr.msk.f32.gmra.mrb[48].mxu1 %vm247_vm1, %v5324_v31 }
 0x588   :  { %4048 = vmatprep.mubr.msk.f32.mxu1 %vm53_vm0, %v5331_v32 }
 0x63e   :  { %v3966_v32 = vpop.f32.mrb[34].mxu1 }
 0x63f   :  { %v2122_v8 = vpop.f32.mrb[35].mxu1 }
 0x642   :  { %v3969_v9 = vpop.f32.mrb[36].mxu1 }
 0x643   :  { %v2132_v13 = vpop.f32.mrb[37].mxu1 }
 0x646   :  { %v3972_v14 = vpop.f32.mrb[38].mxu1 }
 0x647   :  { %4513 = vtanh.f32 %v3972_v14  ;;  %v2142_v58 = vpop.f32.mrb[39].mxu1 }
 0x648   :  { %4515 = vtanh.f32 %v2142_v58 }
 0x649   :  { %4517 = vtanh.f32 %v3966_v32 }
 0x64a   :  { %4519 = vtanh.f32 %v2122_v8  ;;  %v3975_v33 = vpop.f32.mrb[40].mxu1 }
 0x64b   :  { %4521 = vtanh.f32 %v3975_v33  ;;  %v2152_v60 = vpop.f32.mrb[41].mxu1 }
 0x64c   :  { %4523 = vtanh.f32 %v2152_v60 }
 0x64d   :  { %4525 = vtanh.f32 %v3969_v9 }
 0x64e   :  { %4527 = vtanh.f32 %v2132_v13  ;;  %v3978_v10 = vpop.f32.mrb[42].mxu1 }
 0x64f   :  { %4529 = vtanh.f32 %v3978_v10  ;;  %v2162_v15 = vpop.f32.mrb[43].mxu1 }
 0x650   :  { %4531 = vtanh.f32 %v2162_v15 }
 0x651   :  { %v4514_v36 = vpop.eup %4513 }
 0x652   :  { %v4516_v0 = vpop.eup %4515  ;;  %v2218_v40 = vmul.f32 0.5, %v4514_v36  ;;  %v3981_v62 = vpop.f32.mrb[44].mxu1 }
 0x653   :  { %v4518_v61 = vpop.eup %4517  ;;  %v2217_v63 = vmul.f32 0.5, %v4516_v0  ;;  %4533 = vtanh.f32 %v3981_v62  ;;  %v2172_v34 = vpop.f32.mrb[45].mxu1 }
 0x654   :  { %v4520_v59 = vpop.eup %4519  ;;  %v2230_v19 = vadd.f32 0.5, %v2218_v40  ;;  %4535 = vtanh.f32 %v2172_v34 }
 0x655   :  { %v4522_v43 = vpop.eup %4521  ;;  %v2229_v1 = vadd.f32 0.5, %v2217_v63 }
 0x656   :  { %v4524_v48 = vpop.eup %4523  ;;  %v2242_v38 = vmul.f32 %v4518_v61, %v2230_v19  ;;  %v2220_v2 = vmul.f32 0.5, %v4522_v43  ;;  %v3984_v3 = vpop.f32.mrb[46].mxu1 }
 0x657   :  { %v4526_v5 = vpop.eup %4525  ;;  %v2241_v44 = vmul.f32 %v4520_v59, %v2229_v1  ;;  %v2219_v6 = vmul.f32 0.5, %v4524_v48  ;;  %v2182_v7 = vpop.f32.mrb[47].mxu1  ;;  %4537 = vtanh.f32 %v3984_v3 }
 0x658   :  { %v4528_v32 = vpop.eup %4527  ;;  %v2232_v8 = vadd.f32 0.5, %v2220_v2  ;;  %4539 = vtanh.f32 %v2182_v7 }
 0x659   :  { %v4530_v9 = vpop.eup %4529  ;;  %v2231_v13 = vadd.f32 0.5, %v2219_v6 }
 0x65a   :  { %v4532_v14 = vpop.eup %4531  ;;  %v2244_v58 = vmul.f32 %v4526_v5, %v2232_v8  ;;  %v2222_v33 = vmul.f32 0.5, %v4530_v9  ;;  %v3987_v60 = vpop.f32.mrb[48].mxu1 }
 0x65b   :  { %v2243_v10 = vmul.f32 %v4528_v32, %v2231_v13  ;;  %v2221_v15 = vmul.f32 0.5, %v4532_v14  ;;  %v2192_v36 = vpop.f32.mrb[49].mxu1  ;;  %4541 = vtanh.f32 %v3987_v60 }
 0x65c   :  { %v2234_v0 = vadd.f32 0.5, %v2222_v33  ;;  %4543 = vtanh.f32 %v2192_v36 }
 0x65d   :  { %v4534_v40 = vpop.eup %4533  ;;  %v2233_v62 = vadd.f32 0.5, %v2221_v15 }
 0x65e   :  { %v4536_v61 = vpop.eup %4535  ;;  %v2246_v63 = vmul.f32 %v2234_v0, %v5452_v11  ;;  %v2224_v34 = vmul.f32 0.5, %v4534_v40 }
 0x65f   :  { %v2245_v59 = vmul.f32 %v2233_v62, %v5454_v12  ;;  %v2223_v19 = vmul.f32 0.5, %v4536_v61 }
 0x660   :  { %v5535_v43 = vadd.f32 %v2246_v63, %v2242_v38  ;;  %v2236_v1 = vadd.f32 0.5, %v2224_v34  ;;  %v3308_v34 = vld [vmem:[%s5704_s0 + $0x38] sm:$0xff] }
 0x661   :  { %v5537_v48 = vadd.f32 %v2245_v59, %v2241_v44  ;;  %v2235_v2 = vadd.f32 0.5, %v2223_v19  ;;  %v4538_v5 = vpop.eup %4537  ;;  %4046 = vmatprep.subr.mxu1 %v3308_v34 }
 0x662   :  { %4545 = vtanh.f32 %v5535_v43  ;;  %v2248_v3 = vmul.f32 %v2236_v1, %v5460_v54  ;;  %v4540_v12 = vpop.eup %4539  ;;  %v2226_v38 = vmul.f32 0.5, %v4538_v5  ;;  %4047 = vmatpush3.msra.mxu1 %v3308_v34 }
 0x663   :  { %4547 = vtanh.f32 %v5537_v48  ;;  %v2247_v11 = vmul.f32 %v2235_v2, %v5462_v35  ;;  %v2225_v32 = vmul.f32 0.5, %v4540_v12  ;;  %4049 = vmatmul.mubr.msk.f32.vlgmr.msra.gmra.mrb[50].mxu1 %vm53_vm0, %v5341_v4 }
 0x664   :  { %v5543_v6 = vadd.f32 %v2248_v3, %v2244_v58  ;;  %v2238_v9 = vadd.f32 0.5, %v2226_v38  ;;  %4051 = vmatprep.mubr.msk.f32.mxu1 %vm53_vm0, %v5348_v39 }
 0x665   :  { %v5545_v7 = vadd.f32 %v2247_v11, %v2243_v10  ;;  %v4542_v44 = vpop.eup %4541  ;;  %v2237_v14 = vadd.f32 0.5, %v2225_v32 }
 0x666   :  { %4549 = vtanh.f32 %v5543_v6  ;;  %v4544_v8 = vpop.eup %4543  ;;  %v2228_v54 = vmul.f32 0.5, %v4542_v44 }
 0x667   :  { %4551 = vtanh.f32 %v5545_v7  ;;  %v2227_v33 = vmul.f32 0.5, %v4544_v8  ;;  %4052 = vmatmul.mubr.msk.f32.gmra.mrb[52].mxu1 %vm53_vm0, %v5355_v37 }
 0x668   :  { %v2240_v15 = vadd.f32 0.5, %v2228_v54  ;;  %4054 = vmatprep.mubr.msk.f32.mxu1 %vm53_vm0, %v5362_v45 }
 0x669   :  { %v2239_v10 = vadd.f32 0.5, %v2227_v33 }
 0x66b   :  { %4055 = vmatmul.mubr.msk.f32.gmra.mrb[54].mxu1 %vm53_vm0, %v5369_v46 }
 0x66c   :  { %v4546_v13 = vpop.eup %4545  ;;  %4057 = vmatprep.mubr.msk.f32.mxu1 %vm53_vm0, %v5376_v49 }
 0x66d   :  { %v4548_v35 = vpop.eup %4547  ;;  %v2258_v60 = vmul.f32 %v4546_v13, %v2238_v9 }
 0x66e   :  { %v2257_v58 = vmul.f32 %v4548_v35, %v2237_v14 }
 0x66f   :  { %4058 = vmatmul.mubr.msk.f32.gmra.mrb[56].mxu1 %vm53_vm0, %v5383_v41 }
 0x670   :  { %v4550_v36 = vpop.eup %4549  ;;  %v4158_v0 = vpack.c.bf16 %v2258_v60, %v2257_v58  ;;  %4060 = vmatprep.mubr.msk.f32.mxu1 %vm53_vm0, %v5390_v51 }
 0x671   :  { %v4552_v40 = vpop.eup %4551  ;;  %v2260_v62 = vmul.f32 %v4550_v36, %v2240_v15 }
 0x672   :  { %v2259_v61 = vmul.f32 %v4552_v40, %v2239_v10  ;;  %4159 = vmatprep.subr.bf16.mxu0 %v4158_v0 }
 0x673   :  { %4161 = vmatpush3.bf16.msra.mxu0 %v4158_v0  ;;  %4061 = vmatmul.mubr.msk.f32.gmra.mrb[58].mxu1 %vm53_vm0, %v5397_v42 }
 0x674   :  { %v4162_v63 = vpack.c.bf16 %v2260_v62, %v2259_v61  ;;  %4063 = vmatprep.mubr.msk.f32.mxu1 %vm53_vm0, %v5404_v47 }
 0x676   :  { %4163 = vmatprep.subr.bf16.mxu0 %v4162_v63 }
 0x677   :  { %4165 = vmatpush3.bf16.msra.mxu0 %v4162_v63  ;;  %4064 = vmatmul.mubr.msk.f32.gmra.mrb[60].mxu1 %vm53_vm0, %v5411_v52 }
 0x678   :  { %4066 = vmatprep.mubr.msk.f32.mxu1 %vm53_vm0, %v5418_v53 }
 0x67a   :  { %4023 = vmatmul.mubr.msk.f32.vlgmr.msra.gmra.mrb[48].mxu0 %vm247_vm1, %v5226_v16 }
 0x67b   :  { %4025 = vmatprep.mubr.msk.f32.mxu0 %vm247_vm1, %v5233_v17  ;;  %4067 = vmatmul.mubr.msk.f32.gmra.mrb[62].mxu1 %vm53_vm0, %v5425_v57 }
 0x67c   :  { %4069 = vmatprep.mubr.msk.f32.mxu1 %vm53_vm0, %v5432_v56 }
 0x67e   :  { %4026 = vmatmul.mubr.msk.f32.gmra.mrb[50].mxu0 %vm247_vm1, %v5240_v18 }
 0x67f   :  { %4028 = vmatprep.mubr.msk.f32.mxu0 %vm247_vm1, %v5247_v20  ;;  %4070 = vmatmul.mubr.msk.f32.gmra.mrb[64].mxu1 %vm53_vm0, %v5439_v55 }
 0x680   :  { %4080 = vmatprep.mubr.msk.f32.mxu1 %vm247_vm1, %v5446_v50 }
 0x682   :  { %4029 = vmatmul.mubr.msk.f32.gmra.mrb[52].mxu0 %vm247_vm1, %v5254_v21 }
 0x683   :  { %4031 = vmatprep.mubr.msk.f32.mxu0 %vm247_vm1, %v5261_v22 }
 0x686   :  { %4032 = vmatmul.mubr.msk.f32.gmra.mrb[54].mxu0 %vm247_vm1, %v5268_v23 }
 0x687   :  { %4034 = vmatprep.mubr.msk.f32.mxu0 %vm247_vm1, %v5275_v24 }
 0x68a   :  { %4035 = vmatmul.mubr.msk.f32.gmra.mrb[56].mxu0 %vm247_vm1, %v5282_v25 }
 0x68b   :  { %4037 = vmatprep.mubr.msk.f32.mxu0 %vm247_vm1, %v5289_v26 }
 0x68e   :  { %4038 = vmatmul.mubr.msk.f32.gmra.mrb[58].mxu0 %vm247_vm1, %v5296_v27 }
 0x68f   :  { %4040 = vmatprep.mubr.msk.f32.mxu0 %vm247_vm1, %v5303_v28 }
 0x692   :  { %4041 = vmatmul.mubr.msk.f32.gmra.mrb[60].mxu0 %vm247_vm1, %v5310_v29 }
 0x693   :  { %4043 = vmatprep.mubr.msk.f32.mxu0 %vm247_vm1, %v5317_v30 }
 0x696   :  { %4044 = vmatmul.mubr.msk.f32.gmra.mrb[62].mxu0 %vm247_vm1, %v5324_v31 }
 0x74d   :  { %v4024_v4 = vpop.f32.mrb[48].mxu0 }
 0x74e   :  { %v2474_v39 = vpop.f32.mrb[49].mxu0 }
 0x751   :  { %v4027_v37 = vpop.f32.mrb[50].mxu0 }
 0x752   :  { %v2484_v45 = vpop.f32.mrb[51].mxu0 }
 0x755   :  { %v4030_v46 = vpop.f32.mrb[52].mxu0 }
 0x756   :  { %4553 = vtanh.f32 %v4030_v46  ;;  %v2494_v49 = vpop.f32.mrb[53].mxu0 }
 0x757   :  { %4555 = vtanh.f32 %v2494_v49 }
 0x758   :  { %4557 = vtanh.f32 %v4024_v4 }
 0x759   :  { %4559 = vtanh.f32 %v2474_v39  ;;  %v4033_v41 = vpop.f32.mrb[54].mxu0 }
 0x75a   :  { %4561 = vtanh.f32 %v4033_v41  ;;  %v2504_v51 = vpop.f32.mrb[55].mxu0 }
 0x75b   :  { %4563 = vtanh.f32 %v2504_v51 }
 0x75c   :  { %4565 = vtanh.f32 %v4027_v37 }
 0x75d   :  { %4567 = vtanh.f32 %v2484_v45  ;;  %v4036_v42 = vpop.f32.mrb[56].mxu0 }
 0x75e   :  { %4569 = vtanh.f32 %v4036_v42  ;;  %v2514_v47 = vpop.f32.mrb[57].mxu0 }
 0x75f   :  { %4571 = vtanh.f32 %v2514_v47 }
 0x760   :  { %v4554_v52 = vpop.eup %4553 }
 0x761   :  { %v4556_v53 = vpop.eup %4555  ;;  %v2570_v57 = vmul.f32 0.5, %v4554_v52  ;;  %v4039_v56 = vpop.f32.mrb[58].mxu0 }
 0x762   :  { %v4558_v55 = vpop.eup %4557  ;;  %v2569_v50 = vmul.f32 0.5, %v4556_v53  ;;  %4573 = vtanh.f32 %v4039_v56  ;;  %v2524_v59 = vpop.f32.mrb[59].mxu0 }
 0x763   :  { %v4560_v19 = vpop.eup %4559  ;;  %v2582_v1 = vadd.f32 0.5, %v2570_v57  ;;  %4575 = vtanh.f32 %v2524_v59 }
 0x764   :  { %v4562_v2 = vpop.eup %4561  ;;  %v2581_v3 = vadd.f32 0.5, %v2569_v50 }
 0x765   :  { %v4564_v11 = vpop.eup %4563  ;;  %v2594_v5 = vmul.f32 %v4558_v55, %v2582_v1  ;;  %v2572_v12 = vmul.f32 0.5, %v4562_v2  ;;  %v4042_v38 = vpop.f32.mrb[60].mxu0 }
 0x766   :  { %v4566_v44 = vpop.eup %4565  ;;  %v2593_v32 = vmul.f32 %v4560_v19, %v2581_v3  ;;  %v2571_v8 = vmul.f32 0.5, %v4564_v11  ;;  %v2534_v9 = vpop.f32.mrb[61].mxu0  ;;  %4577 = vtanh.f32 %v4042_v38 }
 0x767   :  { %v4568_v54 = vpop.eup %4567  ;;  %v2584_v13 = vadd.f32 0.5, %v2572_v12  ;;  %4579 = vtanh.f32 %v2534_v9 }
 0x768   :  { %v4570_v14 = vpop.eup %4569  ;;  %v2583_v33 = vadd.f32 0.5, %v2571_v8 }
 0x769   :  { %v4572_v35 = vpop.eup %4571  ;;  %v2596_v60 = vmul.f32 %v4566_v44, %v2584_v13  ;;  %v2574_v58 = vmul.f32 0.5, %v4570_v14  ;;  %v4045_v15 = vpop.f32.mrb[62].mxu0 }
 0x76a   :  { %v2595_v36 = vmul.f32 %v4568_v54, %v2583_v33  ;;  %v2573_v10 = vmul.f32 0.5, %v4572_v35  ;;  %v2544_v0 = vpop.f32.mrb[63].mxu0  ;;  %4581 = vtanh.f32 %v4045_v15 }
 0x76b   :  { %v2586_v40 = vadd.f32 0.5, %v2574_v58  ;;  %4583 = vtanh.f32 %v2544_v0 }
 0x76c   :  { %v4574_v62 = vpop.eup %4573  ;;  %v2585_v61 = vadd.f32 0.5, %v2573_v10 }
 0x76d   :  { %v4576_v63 = vpop.eup %4575  ;;  %v2598_v34 = vmul.f32 %v2586_v40, %v5535_v43  ;;  %v2576_v4 = vmul.f32 0.5, %v4574_v62 }
 0x76e   :  { %v2597_v39 = vmul.f32 %v2585_v61, %v5537_v48  ;;  %v2575_v37 = vmul.f32 0.5, %v4576_v63 }
 0x76f   :  { %v5616_v45 = vadd.f32 %v2598_v34, %v2594_v5  ;;  %v2588_v46 = vadd.f32 0.5, %v2576_v4 }
 0x770   :  { %v5618_v49 = vadd.f32 %v2597_v39, %v2593_v32  ;;  %v2587_v41 = vadd.f32 0.5, %v2575_v37  ;;  %v4578_v42 = vpop.eup %4577 }
 0x771   :  { %4585 = vtanh.f32 %v5616_v45  ;;  %v2600_v51 = vmul.f32 %v2588_v46, %v5543_v6  ;;  %v4580_v48 = vpop.eup %4579  ;;  %v2578_v53 = vmul.f32 0.5, %v4578_v42 }
 0x772   :  { %4587 = vtanh.f32 %v5618_v49  ;;  %v2599_v43 = vmul.f32 %v2587_v41, %v5545_v7  ;;  %v2577_v56 = vmul.f32 0.5, %v4580_v48 }
 0x773   :  { %v5624_v47 = vadd.f32 %v2600_v51, %v2596_v60  ;;  %v2590_v50 = vadd.f32 0.5, %v2578_v53 }
 0x774   :  { %v5626_v52 = vadd.f32 %v2599_v43, %v2595_v36  ;;  %v4582_v57 = vpop.eup %4581  ;;  %v2589_v19 = vadd.f32 0.5, %v2577_v56 }
 0x775   :  { %4589 = vtanh.f32 %v5624_v47  ;;  %v4584_v55 = vpop.eup %4583  ;;  %v2580_v6 = vmul.f32 0.5, %v4582_v57 }
 0x776   :  { %4591 = vtanh.f32 %v5626_v52  ;;  %v2579_v1 = vmul.f32 0.5, %v4584_v55 }
 0x777   :  { %v2592_v11 = vadd.f32 0.5, %v2580_v6 }
 0x778   :  { %v2591_v12 = vadd.f32 0.5, %v2579_v1 }
 0x77b   :  { %v4586_v59 = vpop.eup %4585 }
 0x77c   :  { %v4588_v7 = vpop.eup %4587  ;;  %v2610_v2 = vmul.f32 %v4586_v59, %v2590_v50 }
 0x77d   :  { %v2609_v3 = vmul.f32 %v4588_v7, %v2589_v19 }
 0x77f   :  { %v4590_v5 = vpop.eup %4589  ;;  %v4166_v38 = vpack.c.bf16 %v2610_v2, %v2609_v3 }
 0x780   :  { %v4592_v44 = vpop.eup %4591  ;;  %v2612_v32 = vmul.f32 %v4590_v5, %v2592_v11 }
 0x781   :  { %v2611_v8 = vmul.f32 %v4592_v44, %v2591_v12  ;;  %4167 = vmatprep.subr.bf16.mxu1 %v4166_v38 }
 0x782   :  { %4169 = vmatpush3.bf16.msra.mxu1 %v4166_v38 }
 0x783   :  { %v4170_v9 = vpack.c.bf16 %v2612_v32, %v2611_v8 }
 0x785   :  { %4171 = vmatprep.subr.bf16.mxu1 %v4170_v9 }
 0x786   :  { %4173 = vmatpush3.bf16.msra.mxu1 %v4170_v9 }
 0x789   :  { %4081 = vmatmul.mubr.msk.f32.vlgmr.msra.gmra.mrb[50].mxu1 %vm247_vm1, %v5226_v16  ;;  %v2965_v16 = vld [vmem:[%s5707_s3] sm:$0xff] }
 0x78a   :  { %4083 = vmatprep.mubr.msk.f32.mxu1 %vm247_vm1, %v5233_v17  ;;  %4112 = vmatprep.mubr.msk.f32.mxu0 %vm247_vm1, %v2965_v16 }
 0x78d   :  { %4084 = vmatmul.mubr.msk.f32.gmra.mrb[52].mxu1 %vm247_vm1, %v5240_v18 }
 0x78e   :  { %4086 = vmatprep.mubr.msk.f32.mxu1 %vm247_vm1, %v5247_v20 }
 0x791   :  { %4087 = vmatmul.mubr.msk.f32.gmra.mrb[54].mxu1 %vm247_vm1, %v5254_v21 }
 0x792   :  { %4089 = vmatprep.mubr.msk.f32.mxu1 %vm247_vm1, %v5261_v22 }
 0x795   :  { %4090 = vmatmul.mubr.msk.f32.gmra.mrb[56].mxu1 %vm247_vm1, %v5268_v23 }
 0x796   :  { %4092 = vmatprep.mubr.msk.f32.mxu1 %vm247_vm1, %v5275_v24 }
 0x799   :  { %4093 = vmatmul.mubr.msk.f32.gmra.mrb[58].mxu1 %vm247_vm1, %v5282_v25 }
 0x79a   :  { %4095 = vmatprep.mubr.msk.f32.mxu1 %vm247_vm1, %v5289_v26 }
 0x79d   :  { %4096 = vmatmul.mubr.msk.f32.gmra.mrb[60].mxu1 %vm247_vm1, %v5296_v27 }
 0x79e   :  { %4098 = vmatprep.mubr.msk.f32.mxu1 %vm247_vm1, %v5303_v28 }
 0x7a1   :  { %4099 = vmatmul.mubr.msk.f32.gmra.mrb[62].mxu1 %vm247_vm1, %v5310_v29 }
 0x7a2   :  { %4101 = vmatprep.mubr.msk.f32.mxu1 %vm247_vm1, %v5317_v30 }
 0x7a5   :  { %4102 = vmatmul.mubr.msk.f32.gmra.mrb[64].mxu1 %vm247_vm1, %v5324_v31 }
 0x85c   :  { %v4082_v17 = vpop.f32.mrb[50].mxu1 }
 0x85d   :  { %v2826_v18 = vpop.f32.mrb[51].mxu1 }
 0x860   :  { %v4085_v20 = vpop.f32.mrb[52].mxu1 }
 0x861   :  { %v2836_v21 = vpop.f32.mrb[53].mxu1 }
 0x864   :  { %v4088_v22 = vpop.f32.mrb[54].mxu1 }
 0x865   :  { %4593 = vtanh.f32 %v4088_v22  ;;  %v2846_v23 = vpop.f32.mrb[55].mxu1 }
 0x866   :  { %4595 = vtanh.f32 %v2846_v23 }
 0x867   :  { %4597 = vtanh.f32 %v4082_v17 }
 0x868   :  { %4599 = vtanh.f32 %v2826_v18  ;;  %v4091_v24 = vpop.f32.mrb[56].mxu1 }
 0x869   :  { %4601 = vtanh.f32 %v4091_v24  ;;  %v2856_v25 = vpop.f32.mrb[57].mxu1 }
 0x86a   :  { %4603 = vtanh.f32 %v2856_v25 }
 0x86b   :  { %4605 = vtanh.f32 %v4085_v20 }
 0x86c   :  { %4607 = vtanh.f32 %v2836_v21  ;;  %v4094_v26 = vpop.f32.mrb[58].mxu1 }
 0x86d   :  { %4609 = vtanh.f32 %v4094_v26  ;;  %v2866_v27 = vpop.f32.mrb[59].mxu1 }
 0x86e   :  { %4611 = vtanh.f32 %v2866_v27 }
 0x86f   :  { %v4594_v28 = vpop.eup %4593 }
 0x870   :  { %v4596_v29 = vpop.eup %4595  ;;  %v2922_v30 = vmul.f32 0.5, %v4594_v28  ;;  %v4097_v31 = vpop.f32.mrb[60].mxu1 }
 0x871   :  { %v4598_v54 = vpop.eup %4597  ;;  %v2921_v13 = vmul.f32 0.5, %v4596_v29  ;;  %4613 = vtanh.f32 %v4097_v31  ;;  %v2876_v14 = vpop.f32.mrb[61].mxu1 }
 0x872   :  { %v4600_v33 = vpop.eup %4599  ;;  %v2934_v35 = vadd.f32 0.5, %v2922_v30  ;;  %4615 = vtanh.f32 %v2876_v14  ;;  %v2968_v14 = vld [vmem:[%s5707_s3 + $0x18] sm:$0xff] }
 0x873   :  { %v4602_v60 = vpop.eup %4601  ;;  %v2933_v58 = vadd.f32 0.5, %v2921_v13  ;;  %v2967_v13 = vld [vmem:[%s5707_s3 + $0x10] sm:$0xff] }
 0x874   :  { %v4604_v15 = vpop.eup %4603  ;;  %v2946_v36 = vmul.f32 %v4598_v54, %v2934_v35  ;;  %v2924_v10 = vmul.f32 0.5, %v4602_v60  ;;  %v4100_v0 = vpop.f32.mrb[62].mxu1  ;;  %v2966_v54 = vld [vmem:[%s5707_s3 + $0x8] sm:$0xff]  ;;  %v2969_v35 = vld [vmem:[%s5708_s4] sm:$0xff] }
 0x875   :  { %v4606_v40 = vpop.eup %4605  ;;  %v2945_v62 = vmul.f32 %v4600_v33, %v2933_v58  ;;  %v2923_v61 = vmul.f32 0.5, %v4604_v15  ;;  %v2886_v63 = vpop.f32.mrb[63].mxu1  ;;  %4617 = vtanh.f32 %v4100_v0  ;;  %v2970_v33 = vld [vmem:[%s5708_s4 + $0x8] sm:$0xff]  ;;  %v2971_v0 = vld [vmem:[%s5708_s4 + $0x10] sm:$0xff] }
 0x876   :  { %v4608_v34 = vpop.eup %4607  ;;  %v2936_v4 = vadd.f32 0.5, %v2924_v10  ;;  %4619 = vtanh.f32 %v2886_v63  ;;  %v2972_v10 = vld [vmem:[%s5708_s4 + $0x18] sm:$0xff] }
 0x877   :  { %v4610_v39 = vpop.eup %4609  ;;  %v2935_v37 = vadd.f32 0.5, %v2923_v61 }
 0x878   :  { %v4612_v46 = vpop.eup %4611  ;;  %v2948_v41 = vmul.f32 %v4606_v40, %v2936_v4  ;;  %v2926_v51 = vmul.f32 0.5, %v4610_v39  ;;  %v4103_v43 = vpop.f32.mrb[64].mxu1 }
 0x879   :  { %v2947_v42 = vmul.f32 %v4608_v34, %v2935_v37  ;;  %v2925_v48 = vmul.f32 0.5, %v4612_v46  ;;  %v2896_v53 = vpop.f32.mrb[65].mxu1  ;;  %4621 = vtanh.f32 %v4103_v43 }
 0x87a   :  { %v2938_v57 = vadd.f32 0.5, %v2926_v51  ;;  %4623 = vtanh.f32 %v2896_v53 }
 0x87b   :  { %v4614_v56 = vpop.eup %4613  ;;  %v2937_v55 = vadd.f32 0.5, %v2925_v48 }
 0x87c   :  { %v4616_v50 = vpop.eup %4615  ;;  %v2950_v6 = vmul.f32 %v2938_v57, %v5616_v45  ;;  %v2928_v59 = vmul.f32 0.5, %v4614_v56 }
 0x87d   :  { %v2949_v19 = vmul.f32 %v2937_v55, %v5618_v49  ;;  %v2927_v1 = vmul.f32 0.5, %v4616_v50 }
 0x87e   :  { %v2954_v7 = vadd.f32 %v2950_v6, %v2946_v36  ;;  %v2940_v2 = vadd.f32 0.5, %v2928_v59 }
 0x87f   :  { %v2953_v3 = vadd.f32 %v2949_v19, %v2945_v62  ;;  %v2939_v11 = vadd.f32 0.5, %v2927_v1  ;;  %v4618_v38 = vpop.eup %4617 }
 0x880   :  { %4625 = vtanh.f32 %v2954_v7  ;;  %v2952_v5 = vmul.f32 %v2940_v2, %v5624_v47  ;;  %v4620_v32 = vpop.eup %4619  ;;  %v2930_v8 = vmul.f32 0.5, %v4618_v38 }
 0x881   :  { %4627 = vtanh.f32 %v2953_v3  ;;  %v2951_v12 = vmul.f32 %v2939_v11, %v5626_v52  ;;  %v2929_v9 = vmul.f32 0.5, %v4620_v32 }
 0x882   :  { %v2956_v44 = vadd.f32 %v2952_v5, %v2948_v41  ;;  %v2942_v17 = vadd.f32 0.5, %v2930_v8 }
 0x883   :  { %v2955_v45 = vadd.f32 %v2951_v12, %v2947_v42  ;;  %v4622_v49 = vpop.eup %4621  ;;  %v2941_v21 = vadd.f32 0.5, %v2929_v9 }
 0x884   :  { %4629 = vtanh.f32 %v2956_v44  ;;  %v4624_v16 = vpop.eup %4623  ;;  %v2932_v18 = vmul.f32 0.5, %v4622_v49 }
 0x885   :  { %4631 = vtanh.f32 %v2955_v45  ;;  %v2931_v22 = vmul.f32 0.5, %v4624_v16 }
 0x886   :  { %v2944_v25 = vadd.f32 0.5, %v2932_v18 }
 0x887   :  { %v2943_v26 = vadd.f32 0.5, %v2931_v22 }
 0x88a   :  { %v4626_v20 = vpop.eup %4625 }
 0x88b   :  { %v4628_v23 = vpop.eup %4627  ;;  %v2962_v47 = vmul.f32 %v4626_v20, %v2942_v17 }
 0x88c   :  { %v2961_v24 = vmul.f32 %v4628_v23, %v2941_v21 }
 0x88e   :  { %v4630_v52 = vpop.eup %4629  ;;  %v4174_v27 = vpack.c.bf16 %v2962_v47, %v2961_v24 }
 0x88f   :  { %v4632_v28 = vpop.eup %4631  ;;  %v2964_v29 = vmul.f32 %v4630_v52, %v2944_v25 }
 0x890   :  { %v2963_v30 = vmul.f32 %v4632_v28, %v2943_v26  ;;  %4175 = vmatprep.subr.bf16.mxu0 %v4174_v27 }
 0x891   :  { %4177 = vmatpush3.bf16.msra.mxu0 %v4174_v27 }
 0x892   :  { %v4178_v31 = vpack.c.bf16 %v2964_v29, %v2963_v30 }
 0x894   :  { %4179 = vmatprep.subr.bf16.mxu0 %v4178_v31 }
 0x895   :  { %4181 = vmatpush3.bf16.msra.mxu0 %v4178_v31 }
 0x898   :  { %4113 = vmatmul.mubr.msk.f32.vlgmr.msra.gmra.mrb[64].mxu0 %vm247_vm1, %v2966_v54 }
 0x899   :  { %4115 = vmatprep.mubr.msk.f32.mxu0 %vm247_vm1, %v2967_v13 }
 0x89c   :  { %4116 = vmatmul.mubr.msk.f32.gmra.mrb[66].mxu0 %vm247_vm1, %v2968_v14 }
 0x96b   :  { %v4114_v60 = vpop.f32.mrb[64].mxu0 }
 0x96c   :  { %v3057_v58 = vadd.f32 %v4114_v60, %v2970_v33  ;;  %v3051_v15 = vpop.f32.mrb[65].mxu0 }
 0x96d   :  { %v3052_v36 = vadd.f32 %v3051_v15, %v2969_v35 }
 0x96e   :  { %3071 = vst [vmem:[%s5709_s5 + $0x8] sm:$0xff] %v3057_v58 }
 0x96f   :  { %3070 = vst [vmem:[%s5709_s5] sm:$0xff] %v3052_v36  ;;  %v4117_v40 = vpop.f32.mrb[66].mxu0 }
 0x970   :  { %v3067_v62 = vadd.f32 %v4117_v40, %v2972_v10  ;;  %v3061_v61 = vpop.f32.mrb[67].mxu0 }
 0x971   :  { %v3062_v63 = vadd.f32 %v3061_v61, %v2971_v0 }
 0x972   :  { %3073 = vst [vmem:[%s5709_s5 + $0x18] sm:$0xff] %v3067_v62 }
 0x973   :  { %3072 = vst [vmem:[%s5709_s5 + $0x10] sm:$0xff] %v3062_v63 }

</bundles_post_ra>
